<compile_context>
chip_gen: v7x
topology: tpu7x:2x2x1
jax: 0.10.0
libtpu: 0.0.40
codegen_flags: <defaults>
</compile_context>

<pallas_src>
import functools
import math

import jax
import jax.numpy as jnp
from jax.experimental import pallas as pl
from jax.experimental.pallas import tpu as pltpu


# ------------------------------ tiling helpers ------------------------------ #

def _batch_tile(B, cap=8):
    """Largest divisor of B that is <= cap (keeps BN partial stats exact)."""
    tb = min(B, cap)
    while B % tb != 0:
        tb -= 1
    return tb


def _row_tile(n, cap=1024):
    """Row tile for 2-D row-major kernels: whole array if small, else a multiple of 8."""
    return n if n <= cap else (cap // 8) * 8


def _pair_tiles(L, D, d_out):
    """(ti, tj, vmem_limit_bytes) for the pair kernel, derived from chip VMEM."""
    try:
        cap = pltpu.get_tpu_info().vmem_capacity_bytes
    except Exception:
        cap = 64 * 1024 * 1024
    budget = min(int(cap * 0.45), 96 * 1024 * 1024)

    tj = L if L < 8 else 8
    # double-buffered bf16 weights (w2..w4, w5, w6) + f32 biases
    w_bytes = 2 * ((4 * D * D + D * d_out) * 2 + (4 * D + d_out) * 4)

    def usage(ti):
        return (2 * ti * D * 4          # Ai blocks (double-buffered)
                + 2 * tj * D * 4        # Bj blocks
                + 2 * ti * d_out * 4    # output blocks
                + ti * D * 4            # scratch accumulator
                + w_bytes)

    ti = L if L <= 512 else 512
    if ti < L:
        ti = max(8, (ti // 8) * 8)
    while ti > 8 and usage(ti) > budget:
        ti = max(8, ((ti // 2) // 8) * 8)
    return ti, tj, budget


# --------------- Conv1d + bias + LeakyReLU + partial BN statistics ----------- #

def _conv_kernel(xp_ref, w_ref, b_ref, y_ref, s_ref, q_ref):
    # xp_ref: (TB, L + 2P, Cin) f32 padded (and already BN-normalized) input
    # w_ref : (K, Cin, Cout) bf16, b_ref: (1, Cout) f32
    # y_ref : (TB, L, Cout) f32 conv + bias + LeakyReLU(0.1) output
    # s_ref/q_ref: (1, 1, Cout) per-block partial sum / sum-of-squares
    TB, Lp, Cin = xp_ref.shape
    K = w_ref.shape[0]
    L = y_ref.shape[1]

    acc = None
    for k in range(K):        # in-kernel im2col: K shifted (TB*L, Cin) matmuls (bf16 MXU)
        xk = xp_ref[:, k:k + L, :].reshape(TB * L, Cin).astype(jnp.bfloat16)
        c = jnp.dot(xk, w_ref[k], preferred_element_type=jnp.float32)
        acc = c if acc is None else acc + c

    y = acc + b_ref[...]
    y = jnp.maximum(y, 0.1 * y)                         # LeakyReLU(0.1)
    y_ref[...] = y.reshape(TB, L, -1)
    s_ref[...] = jnp.sum(y, axis=0, keepdims=True)[None]
    q_ref[...] = jnp.sum(y * y, axis=0, keepdims=True)[None]


def conv_lrelu_stats(xp, w, b, L):
    """xp: (B, L+2P, Cin) padded input; w: (Cout, Cin, K); b: (Cout,)."""
    B, Lp, Cin = xp.shape
    Cout, _, K = w.shape
    TB = _batch_tile(B)
    NB = B // TB
    wk = jnp.transpose(w, (2, 1, 0)).astype(jnp.bfloat16)   # (K, Cin, Cout)

    return pl.pallas_call(
        _conv_kernel,
        out_shape=(jax.ShapeDtypeStruct((B, L, Cout), jnp.float32),
                   jax.ShapeDtypeStruct((NB, 1, Cout), jnp.float32),
                   jax.ShapeDtypeStruct((NB, 1, Cout), jnp.float32)),
        grid=(NB,),
        in_specs=[
            pl.BlockSpec((TB, Lp, Cin), lambda bi: (bi, 0, 0)),
            pl.BlockSpec((K, Cin, Cout), lambda bi: (0, 0, 0)),
            pl.BlockSpec((1, Cout), lambda bi: (0, 0)),
        ],
        out_specs=(
            pl.BlockSpec((TB, L, Cout), lambda bi: (bi, 0, 0)),
            pl.BlockSpec((1, 1, Cout), lambda bi: (bi, 0, 0)),   # per-block partials
            pl.BlockSpec((1, 1, Cout), lambda bi: (bi, 0, 0)),
        ),
        compiler_params=pltpu.CompilerParams(dimension_semantics=("parallel",)),
    )(xp, wk, b.reshape(1, Cout))


# -------- BatchNorm apply (training-mode stats) + zero-pad for the next conv -------- #

def _bn_pad_kernel(y_ref, s_ref, q_ref, g_ref, be_ref, o_ref, *, inv_n):
    # y_ref: (TB, L, C); s/q: (NB, 1, C) partial stats; g/be: (1, C)
    # o_ref: (TB, L + 2P, C) normalized output, zero-padded for the next conv layer
    L = y_ref.shape[1]
    P = (o_ref.shape[1] - L) // 2

    s = jnp.sum(s_ref[...], axis=0)                     # (1, C)
    q = jnp.sum(q_ref[...], axis=0)
    mean = s * inv_n
    var = jnp.maximum(q * inv_n - mean * mean, 0.0)     # guard E[x^2]-E[x]^2 cancellation
    scale = g_ref[...] * jax.lax.rsqrt(var + 1e-5)
    shift = be_ref[...] - mean * scale
    yn = y_ref[...] * scale[None] + shift[None]

    if P == 0:
        o_ref[...] = yn
    else:
        o_ref[...] = jnp.zeros_like(o_ref)              # zeroed borders (conv padding)
        o_ref[:, P:P + L, :] = yn


def bn_apply_pad(y, s1, s2, gamma, beta, P_next):
    B, L, C = y.shape
    NB = s1.shape[0]
    TB = _batch_tile(B)
    Lp = L + 2 * P_next
    return pl.pallas_call(
        functools.partial(_bn_pad_kernel, inv_n=1.0 / (B * L)),
        out_shape=jax.ShapeDtypeStruct((B, Lp, C), jnp.float32),
        grid=(B // TB,),
        in_specs=[
            pl.BlockSpec((TB, L, C), lambda bi: (bi, 0, 0)),
            pl.BlockSpec((NB, 1, C), lambda bi: (0, 0, 0)),
            pl.BlockSpec((NB, 1, C), lambda bi: (0, 0, 0)),
            pl.BlockSpec((1, C), lambda bi: (0, 0)),
            pl.BlockSpec((1, C), lambda bi: (0, 0)),
        ],
        out_specs=pl.BlockSpec((TB, Lp, C), lambda bi: (bi, 0, 0)),
        compiler_params=pltpu.CompilerParams(dimension_semantics=("parallel",)),
    )(y, s1, s2, gamma.reshape(1, C), beta.reshape(1, C))


def _bn_scale_shift(s1, s2, gamma, beta, n):
    """Fold the training-mode BN into a per-channel scale/shift (tiny wrapper math)."""
    s = jnp.sum(s1, axis=0).reshape(1, -1)
    q = jnp.sum(s2, axis=0).reshape(1, -1)
    mean = s / n
    var = jnp.maximum(q / n - mean * mean, 0.0)
    scale = gamma.reshape(1, -1) * jax.lax.rsqrt(var + 1e-5)
    shift = beta.reshape(1, -1) - mean * scale
    return scale, shift


def conv_branch(x_blc, layers):
    """Multi-layer ConvLayer (dense=False) branch.  Returns the raw last
    conv+LeakyReLU output plus the per-channel scale/shift of its BatchNorm
    (fused downstream into the projection kernel)."""
    B, L, _ = x_blc.shape
    K0 = layers[0][0].shape[2]
    P0 = (K0 - 1) // 2
    cur = jnp.pad(x_blc, ((0, 0), (P0, P0), (0, 0)))    # pad only the raw input once
    for i, (w, b, gamma, beta) in enumerate(layers):
        y, s1, s2 = conv_lrelu_stats(cur, w, b, L)
        if i < len(layers) - 1:
            K_next = layers[i + 1][0].shape[2]
            cur = bn_apply_pad(y, s1, s2, gamma, beta, (K_next - 1) // 2)
        else:
            scale, shift = _bn_scale_shift(s1, s2, gamma, beta, B * L)
            return y, scale, shift


# ----- BN(concat feats) + dual first-layer projection: A = h@W1_top + b1, P = h@W1_bot ----- #

def _bn_dual_proj_kernel(h_ref, sc_ref, sh_ref, w1t_ref, w1b_ref, b1_ref, a_ref, p_ref):
    h = h_ref[...] * sc_ref[...] + sh_ref[...]          # fused final BatchNorm
    hb = h.astype(jnp.bfloat16)
    a_ref[...] = jnp.dot(hb, w1t_ref[...], preferred_element_type=jnp.float32) + b1_ref[...]
    p_ref[...] = jnp.dot(hb, w1b_ref[...], preferred_element_type=jnp.float32)


def dual_projection(h_rows, scale, shift, w1t, w1b, b1):
    R, C = h_rows.shape
    D = w1t.shape[1]
    TM = _row_tile(R)
    return pl.pallas_call(
        _bn_dual_proj_kernel,
        out_shape=(jax.ShapeDtypeStruct((R, D), jnp.float32),
                   jax.ShapeDtypeStruct((R, D), jnp.float32)),
        grid=(pl.cdiv(R, TM),),
        in_specs=[
            pl.BlockSpec((TM, C), lambda i: (i, 0)),
            pl.BlockSpec((1, C), lambda i: (0, 0)),
            pl.BlockSpec((1, C), lambda i: (0, 0)),
            pl.BlockSpec((C, D), lambda i: (0, 0)),
            pl.BlockSpec((C, D), lambda i: (0, 0)),
            pl.BlockSpec((1, D), lambda i: (0, 0)),
        ],
        out_specs=(pl.BlockSpec((TM, D), lambda i: (i, 0)),
                   pl.BlockSpec((TM, D), lambda i: (i, 0))),
        compiler_params=pltpu.CompilerParams(dimension_semantics=("parallel",)),
    )(h_rows, scale, shift, w1t, w1b, b1.reshape(1, D))


# ----- pairwise relation MLP (hidden layers) + mean over j + fused output MLP ----- #

def _pair_mlp_kernel(ai_ref, bj_ref, w2_ref, b2_ref, w3_ref, b3_ref,
                     w4_ref, b4_ref, w5_ref, b5_ref, w6_ref, b6_ref,
                     o_ref, acc_ref, *, L):
    # ai_ref: (ti, D) = x_i @ W1_top + b1 for a tile of i positions (one batch element)
    # bj_ref: (tj, D) = x_j @ W1_bot for a tile of j positions (same batch element)
    # o_ref : (ti, d_out); acc_ref: (ti, D) VMEM accumulator over the j grid axis
    jt = pl.program_id(2)
    tj = bj_ref.shape[0]

    @pl.when(jt == 0)
    def _():
        acc_ref[...] = jnp.zeros_like(acc_ref)

    ai = ai_ref[...]
    w2 = w2_ref[...]; w3 = w3_ref[...]; w4 = w4_ref[...]
    b2 = b2_ref[...]; b3 = b3_ref[...]; b4 = b4_ref[...]
    j_base = jt * tj
    need_mask = (L % tj) != 0

    def body(jj, acc):
        bj = bj_ref[pl.ds(jj, 1), :]                    # (1, D), broadcast over the i rows
        z = ai + bj                                     # implicit concat([x_i, x_j]) @ W1 + b1
        z = jnp.maximum(z, 0.1 * z)
        z = jnp.dot(z.astype(jnp.bfloat16), w2, preferred_element_type=jnp.float32) + b2
        z = jnp.maximum(z, 0.1 * z)
        z = jnp.dot(z.astype(jnp.bfloat16), w3, preferred_element_type=jnp.float32) + b3
        z = jnp.maximum(z, 0.1 * z)
        z = jnp.dot(z.astype(jnp.bfloat16), w4, preferred_element_type=jnp.float32) + b4
        z = jnp.maximum(z, 0.1 * z)
        if need_mask:                                   # j tail of the last block
            z = jnp.where(j_base + jj < L, z, 0.0)
        return acc + z

    acc_ref[...] += jax.lax.fori_loop(0, tj, body, jnp.zeros_like(ai), unroll=True)

    @pl.when(jt == pl.num_programs(2) - 1)
    def _():
        m = acc_ref[...] * (1.0 / L)                    # mean over j
        z = jnp.dot(m.astype(jnp.bfloat16), w5_ref[...],
                    preferred_element_type=jnp.float32) + b5_ref[...]
        z = jnp.maximum(z, 0.1 * z)
        z = jnp.dot(z.astype(jnp.bfloat16), w6_ref[...],
                    preferred_element_type=jnp.float32) + b6_ref[...]
        o_ref[...] = jnp.maximum(z, 0.1 * z)


def pair_relation(a_bld, p_bld, hidden, out_layers):
    B, L, D = a_bld.shape
    (w2, b2), (w3, b3), (w4, b4) = hidden
    (w5, b5), (w6, b6) = out_layers
    d_out = w6.shape[1]
    ti, tj, vmem_limit = _pair_tiles(L, D, d_out)
    NI, NJ = pl.cdiv(L, ti), pl.cdiv(L, tj)
    c3 = lambda b, it, jt: (0, 0)

    return pl.pallas_call(
        functools.partial(_pair_mlp_kernel, L=L),
        out_shape=jax.ShapeDtypeStruct((B, L, d_out), jnp.float32),
        grid=(B, NI, NJ),
        in_specs=[
            pl.BlockSpec((None, ti, D), lambda b, it, jt: (b, it, 0)),   # x_i projection
            pl.BlockSpec((None, tj, D), lambda b, it, jt: (b, jt, 0)),   # x_j projection
            pl.BlockSpec((D, D), c3), pl.BlockSpec((1, D), c3),
            pl.BlockSpec((D, D), c3), pl.BlockSpec((1, D), c3),
            pl.BlockSpec((D, D), c3), pl.BlockSpec((1, D), c3),
            pl.BlockSpec((D, D), c3), pl.BlockSpec((1, D), c3),
            pl.BlockSpec((D, d_out), c3), pl.BlockSpec((1, d_out), c3),
        ],
        out_specs=pl.BlockSpec((None, ti, d_out), lambda b, it, jt: (b, it, 0)),
        scratch_shapes=[pltpu.VMEM((ti, D), jnp.float32)],
        compiler_params=pltpu.CompilerParams(
            dimension_semantics=("parallel", "parallel", "arbitrary"),
            vmem_limit_bytes=vmem_limit),
    )(a_bld, p_bld,
      w2, b2.reshape(1, D), w3, b3.reshape(1, D), w4, b4.reshape(1, D),
      w5, b5.reshape(1, D), w6, b6.reshape(1, d_out))


# --------------------------------- params ------------------------------------ #

def init_params(key, d_in, d_out, n_windows, d_chns, d_mlp, n_conv_layers):
    keys = iter(jax.random.split(key, 512))

    def lin_init(fan_in, fan_out):
        bound = 1.0 / math.sqrt(fan_in)
        w = jax.random.uniform(next(keys), (fan_in, fan_out), jnp.float32, -bound, bound)
        b = jax.random.uniform(next(keys), (fan_out,), jnp.float32, -bound, bound)
        return w, b

    params = {"convs": [], "mlp": [], "mlp_layer": []}
    for fw, ch in zip(n_windows, d_chns):
        assert fw % 2 == 1, "same-length conv requires odd window size"
        branch = []
        for i in range(n_conv_layers):
            cin = d_in if i == 0 else ch               # dense=False path of RelationLayer2
            bound = 1.0 / math.sqrt(cin * fw)
            w = jax.random.uniform(next(keys), (ch, cin, fw), jnp.float32, -bound, bound)
            b = jax.random.uniform(next(keys), (ch,), jnp.float32, -bound, bound)
            branch.append((w, b, jnp.ones((ch,), jnp.float32), jnp.zeros((ch,), jnp.float32)))
        params["convs"].append(branch)

    d_chn = sum(d_chns)
    params["mlp"].append(lin_init(2 * d_chn, d_mlp))
    for _ in range(3):
        params["mlp"].append(lin_init(d_mlp, d_mlp))
    params["mlp_layer"].append(lin_init(d_mlp, d_mlp))
    params["mlp_layer"].append(lin_init(d_mlp, d_out))
    return params


# --------------------------------- forward ----------------------------------- #

def relation_layer2_forward(params, x):
    """x: (L, B, E) float32 -> (L, B, d_out) float32   (xs_mask=None path)."""
    L, B, E = x.shape
    h = jnp.transpose(x, (1, 0, 2))                     # (B, L, E) channels-last

    # multi-window CNN branches (conv + LeakyReLU + BN, batch-blocked Pallas kernels)
    ys, scales, shifts = [], [], []
    for branch in params["convs"]:
        y, sc, sh = conv_branch(h, branch)
        ys.append(y); scales.append(sc); shifts.append(sh)
    hc = jnp.concatenate(ys, axis=-1)                   # (B, L, C) pre-BN last-layer features
    scale = jnp.concatenate(scales, axis=-1)            # (1, C) fused last-layer BN params
    shift = jnp.concatenate(shifts, axis=-1)

    # BN + first relation-MLP layer projections (hoisted out of the pair grid)
    C = hc.shape[-1]
    w1, b1 = params["mlp"][0]
    D = w1.shape[1]
    w1t = w1[:C].astype(jnp.bfloat16)                   # implicit concat([x_i, x_j]) @ W1
    w1b = w1[C:].astype(jnp.bfloat16)
    a, p = dual_projection(hc.reshape(B * L, C), scale, shift, w1t, w1b, b1)
    a_bld = a.reshape(B, L, D)
    p_bld = p.reshape(B, L, D)

    # pairwise relation MLP + mean over j + fused 2-layer output MLP (single kernel)
    hidden = [(w.astype(jnp.bfloat16), b) for (w, b) in params["mlp"][1:]]
    out_layers = [(w.astype(jnp.bfloat16), b) for (w, b) in params["mlp_layer"]]
    out = pair_relation(a_bld, p_bld, hidden, out_layers)   # (B, L, d_out)
    return jnp.transpose(out, (1, 0, 2))                    # (L, B, d_out)


# ---------------------------------- main -------------------------------------- #

if __name__ == "__main__":
    L, B = 8, 2
    d_in, d_out = 8, 16
    n_windows = (3, 5)
    d_chns = (8, 8)
    d_mlp = 32
    n_conv_layers = 2

    key = jax.random.PRNGKey(0)
    pkey, xkey = jax.random.split(key)
    params = init_params(pkey, d_in, d_out, n_windows, d_chns, d_mlp, n_conv_layers)
    x = jax.random.normal(xkey, (L, B, d_in), dtype=jnp.float32)

    fwd = jax.jit(relation_layer2_forward)
    out = jax.block_until_ready(fwd(params, x))
    assert out.shape == (L, B, d_out), out.shape
    assert jnp.isfinite(out).all()
    print("KERNEL_OK")
</pallas_src>

<mosaic_0001>
module attributes {stable_mosaic.version = 11 : i64} {
  func.func @_conv_kernel(%arg0: i32, %arg1: memref<2x10x8xf32, #tpu.memory_space<vmem>>, %arg2: memref<3x8x8xbf16, #tpu.memory_space<vmem>>, %arg3: memref<1x8xf32, #tpu.memory_space<vmem>>, %arg4: memref<2x8x8xf32, #tpu.memory_space<vmem>>, %arg5: memref<1x1x8xf32, #tpu.memory_space<vmem>>, %arg6: memref<1x1x8xf32, #tpu.memory_space<vmem>>) attributes {dimension_semantics = [#tpu.dimension_semantics<parallel>], iteration_bounds = array<i64: 1>, scalar_prefetch = 0 : i64, scratch_operands = 0 : i64, tpu.core_type = #tpu.core_type<tc>, window_params = [{transform_indices = @transform_0, window_bounds = array<i64: 2, 10, 8>}, {pipeline_mode = #tpu.pipeline_mode<synchronous>, transform_indices = @transform_1, window_bounds = array<i64: 3, 8, 8>}, {pipeline_mode = #tpu.pipeline_mode<synchronous>, transform_indices = @transform_2, window_bounds = array<i64: 1, 8>}, {transform_indices = @transform_3, window_bounds = array<i64: 2, 8, 8>}, {transform_indices = @transform_4, window_bounds = array<i64: 1, 1, 8>}, {transform_indices = @transform_5, window_bounds = array<i64: 1, 1, 8>}]} {
    %c0 = arith.constant 0 : index
    %c0_0 = arith.constant 0 : index
    %c0_1 = arith.constant 0 : index
    %0 = vector.load %arg1[%c0, %c0_0, %c0_1] : memref<2x10x8xf32, #tpu.memory_space<vmem>>, vector<2x8x8xf32>
    %1 = vector.shape_cast %0 : vector<2x8x8xf32> to vector<16x8xf32>
    %2 = arith.truncf %1 : vector<16x8xf32> to vector<16x8xbf16>
    %c0_2 = arith.constant 0 : index
    %c0_3 = arith.constant 0 : index
    %c0_4 = arith.constant 0 : index
    %3 = vector.load %arg2[%c0_2, %c0_3, %c0_4] : memref<3x8x8xbf16, #tpu.memory_space<vmem>>, vector<1x8x8xbf16>
    %4 = vector.shape_cast %3 : vector<1x8x8xbf16> to vector<8x8xbf16>
    %cst = arith.constant dense<0.000000e+00> : vector<16x8xf32>
    %5 = tpu.matmul %2, %4, %cst {dimension_numbers = #tpu.dot_dimension_numbers<[1], [0], [0], [1], [0, 0, 1, 1], [], []>} : vector<16x8xbf16>, vector<8x8xbf16>, vector<16x8xf32> -> vector<16x8xf32>
    %c0_5 = arith.constant 0 : index
    %c1 = arith.constant 1 : index
    %c0_6 = arith.constant 0 : index
    %6 = vector.load %arg1[%c0_5, %c1, %c0_6] : memref<2x10x8xf32, #tpu.memory_space<vmem>>, vector<2x8x8xf32>
    %7 = vector.shape_cast %6 : vector<2x8x8xf32> to vector<16x8xf32>
    %8 = arith.truncf %7 : vector<16x8xf32> to vector<16x8xbf16>
    %c1_7 = arith.constant 1 : index
    %c0_8 = arith.constant 0 : index
    %c0_9 = arith.constant 0 : index
    %9 = vector.load %arg2[%c1_7, %c0_8, %c0_9] : memref<3x8x8xbf16, #tpu.memory_space<vmem>>, vector<1x8x8xbf16>
    %10 = vector.shape_cast %9 : vector<1x8x8xbf16> to vector<8x8xbf16>
    %cst_10 = arith.constant dense<0.000000e+00> : vector<16x8xf32>
    %11 = tpu.matmul %8, %10, %cst_10 {dimension_numbers = #tpu.dot_dimension_numbers<[1], [0], [0], [1], [0, 0, 1, 1], [], []>} : vector<16x8xbf16>, vector<8x8xbf16>, vector<16x8xf32> -> vector<16x8xf32>
    %12 = arith.addf %5, %11 : vector<16x8xf32>
    %c0_11 = arith.constant 0 : index
    %c2 = arith.constant 2 : index
    %c0_12 = arith.constant 0 : index
    %13 = vector.load %arg1[%c0_11, %c2, %c0_12] : memref<2x10x8xf32, #tpu.memory_space<vmem>>, vector<2x8x8xf32>
    %14 = vector.shape_cast %13 : vector<2x8x8xf32> to vector<16x8xf32>
    %15 = arith.truncf %14 : vector<16x8xf32> to vector<16x8xbf16>
    %c2_13 = arith.constant 2 : index
    %c0_14 = arith.constant 0 : index
    %c0_15 = arith.constant 0 : index
    %16 = vector.load %arg2[%c2_13, %c0_14, %c0_15] : memref<3x8x8xbf16, #tpu.memory_space<vmem>>, vector<1x8x8xbf16>
    %17 = vector.shape_cast %16 : vector<1x8x8xbf16> to vector<8x8xbf16>
    %cst_16 = arith.constant dense<0.000000e+00> : vector<16x8xf32>
    %18 = tpu.matmul %15, %17, %cst_16 {dimension_numbers = #tpu.dot_dimension_numbers<[1], [0], [0], [1], [0, 0, 1, 1], [], []>} : vector<16x8xbf16>, vector<8x8xbf16>, vector<16x8xf32> -> vector<16x8xf32>
    %19 = arith.addf %12, %18 : vector<16x8xf32>
    %c0_17 = arith.constant 0 : index
    %c0_18 = arith.constant 0 : index
    %20 = vector.load %arg3[%c0_17, %c0_18] : memref<1x8xf32, #tpu.memory_space<vmem>>, vector<1x8xf32>
    %21 = vector.broadcast %20 : vector<1x8xf32> to vector<16x8xf32>
    %22 = arith.addf %19, %21 : vector<16x8xf32>
    %cst_19 = arith.constant 1.000000e-01 : f32
    %23 = vector.broadcast %cst_19 : f32 to vector<16x8xf32>
    %24 = arith.mulf %23, %22 : vector<16x8xf32>
    %25 = arith.maximumf %22, %24 : vector<16x8xf32>
    %26 = vector.shape_cast %25 : vector<16x8xf32> to vector<2x8x8xf32>
    %c0_20 = arith.constant 0 : index
    %c0_21 = arith.constant 0 : index
    %c0_22 = arith.constant 0 : index
    %27 = vector.load %arg4[%c0_20, %c0_21, %c0_22] : memref<2x8x8xf32, #tpu.memory_space<vmem>>, vector<2x8x8xf32>
    tpu.vector_store %arg4[%c0_20, %c0_21, %c0_22], %26 {strides = array<i32>} : memref<2x8x8xf32, #tpu.memory_space<vmem>>, vector<2x8x8xf32>,
    %cst_23 = arith.constant dense<0.000000e+00> : vector<8xf32>
    %28 = vector.multi_reduction <add>, %25, %cst_23 [0] : vector<16x8xf32> to vector<8xf32>
    %29 = vector.shape_cast %28 : vector<8xf32> to vector<1x8xf32>
    %30 = vector.shape_cast %29 : vector<1x8xf32> to vector<1x1x8xf32>
    %c0_24 = arith.constant 0 : index
    %c0_25 = arith.constant 0 : index
    %c0_26 = arith.constant 0 : index
    %31 = vector.load %arg5[%c0_24, %c0_25, %c0_26] : memref<1x1x8xf32, #tpu.memory_space<vmem>>, vector<1x1x8xf32>
    tpu.vector_store %arg5[%c0_24, %c0_25, %c0_26], %30 {strides = array<i32>} : memref<1x1x8xf32, #tpu.memory_space<vmem>>, vector<1x1x8xf32>,
    %32 = arith.mulf %25, %25 : vector<16x8xf32>
    %cst_27 = arith.constant dense<0.000000e+00> : vector<8xf32>
    %33 = vector.multi_reduction <add>, %32, %cst_27 [0] : vector<16x8xf32> to vector<8xf32>
    %34 = vector.shape_cast %33 : vector<8xf32> to vector<1x8xf32>
    %35 = vector.shape_cast %34 : vector<1x8xf32> to vector<1x1x8xf32>
    %c0_28 = arith.constant 0 : index
    %c0_29 = arith.constant 0 : index
    %c0_30 = arith.constant 0 : index
    %36 = vector.load %arg6[%c0_28, %c0_29, %c0_30] : memref<1x1x8xf32, #tpu.memory_space<vmem>>, vector<1x1x8xf32>
    tpu.vector_store %arg6[%c0_28, %c0_29, %c0_30], %35 {strides = array<i32>} : memref<1x1x8xf32, #tpu.memory_space<vmem>>, vector<1x1x8xf32>,
    return
  }
  func.func @transform_0(%arg0: i32) -> (i32, i32, i32) {
    %c0_i32 = arith.constant 0 : i32
    %c0_i32_0 = arith.constant 0 : i32
    %c0_i32_1 = arith.constant 0 : i32
    return %arg0, %c0_i32, %c0_i32_0 : i32, i32, i32
  }
  func.func @transform_1(%arg0: i32) -> (i32, i32, i32) {
    %c0_i32 = arith.constant 0 : i32
    %c0_i32_0 = arith.constant 0 : i32
    %c0_i32_1 = arith.constant 0 : i32
    %c0_i32_2 = arith.constant 0 : i32
    return %c0_i32, %c0_i32_0, %c0_i32_1 : i32, i32, i32
  }
  func.func @transform_2(%arg0: i32) -> (i32, i32) {
    %c0_i32 = arith.constant 0 : i32
    %c0_i32_0 = arith.constant 0 : i32
    %c0_i32_1 = arith.constant 0 : i32
    return %c0_i32, %c0_i32_0 : i32, i32
  }
  func.func @transform_3(%arg0: i32) -> (i32, i32, i32) {
    %c0_i32 = arith.constant 0 : i32
    %c0_i32_0 = arith.constant 0 : i32
    %c0_i32_1 = arith.constant 0 : i32
    return %arg0, %c0_i32, %c0_i32_0 : i32, i32, i32
  }
  func.func @transform_4(%arg0: i32) -> (i32, i32, i32) {
    %c0_i32 = arith.constant 0 : i32
    %c0_i32_0 = arith.constant 0 : i32
    %c0_i32_1 = arith.constant 0 : i32
    return %arg0, %c0_i32, %c0_i32_0 : i32, i32, i32
  }
  func.func @transform_5(%arg0: i32) -> (i32, i32, i32) {
    %c0_i32 = arith.constant 0 : i32
    %c0_i32_0 = arith.constant 0 : i32
    %c0_i32_1 = arith.constant 0 : i32
    return %arg0, %c0_i32, %c0_i32_0 : i32, i32, i32
  }
}

module attributes {stable_mosaic.version = 11 : i64} {
  func.func @_bn_pad_kernel(%arg0: i32, %arg1: memref<2x8x8xf32, #tpu.memory_space<vmem>>, %arg2: memref<1x1x8xf32, #tpu.memory_space<vmem>>, %arg3: memref<1x1x8xf32, #tpu.memory_space<vmem>>, %arg4: memref<1x8xf32, #tpu.memory_space<vmem>>, %arg5: memref<1x8xf32, #tpu.memory_space<vmem>>, %arg6: memref<2x10x8xf32, #tpu.memory_space<vmem>>) attributes {dimension_semantics = [#tpu.dimension_semantics<parallel>], iteration_bounds = array<i64: 1>, scalar_prefetch = 0 : i64, scratch_operands = 0 : i64, tpu.core_type = #tpu.core_type<tc>, window_params = [{transform_indices = @transform_0, window_bounds = array<i64: 2, 8, 8>}, {pipeline_mode = #tpu.pipeline_mode<synchronous>, transform_indices = @transform_1, window_bounds = array<i64: 1, 1, 8>}, {pipeline_mode = #tpu.pipeline_mode<synchronous>, transform_indices = @transform_2, window_bounds = array<i64: 1, 1, 8>}, {pipeline_mode = #tpu.pipeline_mode<synchronous>, transform_indices = @transform_3, window_bounds = array<i64: 1, 8>}, {pipeline_mode = #tpu.pipeline_mode<synchronous>, transform_indices = @transform_4, window_bounds = array<i64: 1, 8>}, {transform_indices = @transform_5, window_bounds = array<i64: 2, 10, 8>}]} {
    %c0 = arith.constant 0 : index
    %c0_0 = arith.constant 0 : index
    %c0_1 = arith.constant 0 : index
    %0 = vector.load %arg2[%c0, %c0_0, %c0_1] : memref<1x1x8xf32, #tpu.memory_space<vmem>>, vector<1x1x8xf32>
    %cst = arith.constant dense<0.000000e+00> : vector<1x8xf32>
    %1 = vector.multi_reduction <add>, %0, %cst [0] : vector<1x1x8xf32> to vector<1x8xf32>
    %c0_2 = arith.constant 0 : index
    %c0_3 = arith.constant 0 : index
    %c0_4 = arith.constant 0 : index
    %2 = vector.load %arg3[%c0_2, %c0_3, %c0_4] : memref<1x1x8xf32, #tpu.memory_space<vmem>>, vector<1x1x8xf32>
    %cst_5 = arith.constant dense<0.000000e+00> : vector<1x8xf32>
    %3 = vector.multi_reduction <add>, %2, %cst_5 [0] : vector<1x1x8xf32> to vector<1x8xf32>
    %cst_6 = arith.constant 6.250000e-02 : f32
    %4 = vector.broadcast %cst_6 : f32 to vector<1x8xf32>
    %5 = arith.mulf %1, %4 : vector<1x8xf32>
    %cst_7 = arith.constant 6.250000e-02 : f32
    %6 = vector.broadcast %cst_7 : f32 to vector<1x8xf32>
    %7 = arith.mulf %3, %6 : vector<1x8xf32>
    %8 = arith.mulf %5, %5 : vector<1x8xf32>
    %9 = arith.subf %7, %8 : vector<1x8xf32>
    %cst_8 = arith.constant 0.000000e+00 : f32
    %10 = vector.broadcast %cst_8 : f32 to vector<1x8xf32>
    %11 = arith.maximumf %9, %10 : vector<1x8xf32>
    %c0_9 = arith.constant 0 : index
    %c0_10 = arith.constant 0 : index
    %12 = vector.load %arg4[%c0_9, %c0_10] : memref<1x8xf32, #tpu.memory_space<vmem>>, vector<1x8xf32>
    %cst_11 = arith.constant 9.99999974E-6 : f32
    %13 = vector.broadcast %cst_11 : f32 to vector<1x8xf32>
    %14 = arith.addf %11, %13 : vector<1x8xf32>
    %15 = math.rsqrt %14 : vector<1x8xf32>
    %16 = arith.mulf %12, %15 : vector<1x8xf32>
    %c0_12 = arith.constant 0 : index
    %c0_13 = arith.constant 0 : index
    %17 = vector.load %arg5[%c0_12, %c0_13] : memref<1x8xf32, #tpu.memory_space<vmem>>, vector<1x8xf32>
    %18 = arith.mulf %5, %16 : vector<1x8xf32>
    %19 = arith.subf %17, %18 : vector<1x8xf32>
    %c0_14 = arith.constant 0 : index
    %c0_15 = arith.constant 0 : index
    %c0_16 = arith.constant 0 : index
    %20 = vector.load %arg1[%c0_14, %c0_15, %c0_16] : memref<2x8x8xf32, #tpu.memory_space<vmem>>, vector<2x8x8xf32>
    %21 = vector.shape_cast %16 : vector<1x8xf32> to vector<1x1x8xf32>
    %22 = vector.broadcast %21 : vector<1x1x8xf32> to vector<2x8x8xf32>
    %23 = arith.mulf %20, %22 : vector<2x8x8xf32>
    %24 = vector.shape_cast %19 : vector<1x8xf32> to vector<1x1x8xf32>
    %25 = vector.broadcast %24 : vector<1x1x8xf32> to vector<2x8x8xf32>
    %26 = arith.addf %23, %25 : vector<2x8x8xf32>
    %cst_17 = arith.constant 0.000000e+00 : f32
    %27 = vector.broadcast %cst_17 : f32 to vector<2x10x8xf32>
    %c0_18 = arith.constant 0 : index
    %c0_19 = arith.constant 0 : index
    %c0_20 = arith.constant 0 : index
    %28 = vector.load %arg6[%c0_18, %c0_19, %c0_20] : memref<2x10x8xf32, #tpu.memory_space<vmem>>, vector<2x10x8xf32>
    tpu.vector_store %arg6[%c0_18, %c0_19, %c0_20], %27 {strides = array<i32>} : memref<2x10x8xf32, #tpu.memory_space<vmem>>, vector<2x10x8xf32>,
    %c0_21 = arith.constant 0 : index
    %c1 = arith.constant 1 : index
    %c0_22 = arith.constant 0 : index
    %29 = vector.load %arg6[%c0_21, %c1, %c0_22] : memref<2x10x8xf32, #tpu.memory_space<vmem>>, vector<2x8x8xf32>
    tpu.vector_store %arg6[%c0_21, %c1, %c0_22], %26 {strides = array<i32>} : memref<2x10x8xf32, #tpu.memory_space<vmem>>, vector<2x8x8xf32>,
    return
  }
  func.func @transform_0(%arg0: i32) -> (i32, i32, i32) {
    %c0_i32 = arith.constant 0 : i32
    %c0_i32_0 = arith.constant 0 : i32
    %c0_i32_1 = arith.constant 0 : i32
    return %arg0, %c0_i32, %c0_i32_0 : i32, i32, i32
  }
  func.func @transform_1(%arg0: i32) -> (i32, i32, i32) {
    %c0_i32 = arith.constant 0 : i32
    %c0_i32_0 = arith.constant 0 : i32
    %c0_i32_1 = arith.constant 0 : i32
    %c0_i32_2 = arith.constant 0 : i32
    return %c0_i32, %c0_i32_0, %c0_i32_1 : i32, i32, i32
  }
  func.func @transform_2(%arg0: i32) -> (i32, i32, i32) {
    %c0_i32 = arith.constant 0 : i32
    %c0_i32_0 = arith.constant 0 : i32
    %c0_i32_1 = arith.constant 0 : i32
    %c0_i32_2 = arith.constant 0 : i32
    return %c0_i32, %c0_i32_0, %c0_i32_1 : i32, i32, i32
  }
  func.func @transform_3(%arg0: i32) -> (i32, i32) {
    %c0_i32 = arith.constant 0 : i32
    %c0_i32_0 = arith.constant 0 : i32
    %c0_i32_1 = arith.constant 0 : i32
    return %c0_i32, %c0_i32_0 : i32, i32
  }
  func.func @transform_4(%arg0: i32) -> (i32, i32) {
    %c0_i32 = arith.constant 0 : i32
    %c0_i32_0 = arith.constant 0 : i32
    %c0_i32_1 = arith.constant 0 : i32
    return %c0_i32, %c0_i32_0 : i32, i32
  }
  func.func @transform_5(%arg0: i32) -> (i32, i32, i32) {
    %c0_i32 = arith.constant 0 : i32
    %c0_i32_0 = arith.constant 0 : i32
    %c0_i32_1 = arith.constant 0 : i32
    return %arg0, %c0_i32, %c0_i32_0 : i32, i32, i32
  }
}

module attributes {stable_mosaic.version = 11 : i64} {
  func.func @_conv_kernel(%arg0: i32, %arg1: memref<2x12x8xf32, #tpu.memory_space<vmem>>, %arg2: memref<5x8x8xbf16, #tpu.memory_space<vmem>>, %arg3: memref<1x8xf32, #tpu.memory_space<vmem>>, %arg4: memref<2x8x8xf32, #tpu.memory_space<vmem>>, %arg5: memref<1x1x8xf32, #tpu.memory_space<vmem>>, %arg6: memref<1x1x8xf32, #tpu.memory_space<vmem>>) attributes {dimension_semantics = [#tpu.dimension_semantics<parallel>], iteration_bounds = array<i64: 1>, scalar_prefetch = 0 : i64, scratch_operands = 0 : i64, tpu.core_type = #tpu.core_type<tc>, window_params = [{transform_indices = @transform_0, window_bounds = array<i64: 2, 12, 8>}, {pipeline_mode = #tpu.pipeline_mode<synchronous>, transform_indices = @transform_1, window_bounds = array<i64: 5, 8, 8>}, {pipeline_mode = #tpu.pipeline_mode<synchronous>, transform_indices = @transform_2, window_bounds = array<i64: 1, 8>}, {transform_indices = @transform_3, window_bounds = array<i64: 2, 8, 8>}, {transform_indices = @transform_4, window_bounds = array<i64: 1, 1, 8>}, {transform_indices = @transform_5, window_bounds = array<i64: 1, 1, 8>}]} {
    %c0 = arith.constant 0 : index
    %c0_0 = arith.constant 0 : index
    %c0_1 = arith.constant 0 : index
    %0 = vector.load %arg1[%c0, %c0_0, %c0_1] : memref<2x12x8xf32, #tpu.memory_space<vmem>>, vector<2x8x8xf32>
    %1 = vector.shape_cast %0 : vector<2x8x8xf32> to vector<16x8xf32>
    %2 = arith.truncf %1 : vector<16x8xf32> to vector<16x8xbf16>
    %c0_2 = arith.constant 0 : index
    %c0_3 = arith.constant 0 : index
    %c0_4 = arith.constant 0 : index
    %3 = vector.load %arg2[%c0_2, %c0_3, %c0_4] : memref<5x8x8xbf16, #tpu.memory_space<vmem>>, vector<1x8x8xbf16>
    %4 = vector.shape_cast %3 : vector<1x8x8xbf16> to vector<8x8xbf16>
    %cst = arith.constant dense<0.000000e+00> : vector<16x8xf32>
    %5 = tpu.matmul %2, %4, %cst {dimension_numbers = #tpu.dot_dimension_numbers<[1], [0], [0], [1], [0, 0, 1, 1], [], []>} : vector<16x8xbf16>, vector<8x8xbf16>, vector<16x8xf32> -> vector<16x8xf32>
    %c0_5 = arith.constant 0 : index
    %c1 = arith.constant 1 : index
    %c0_6 = arith.constant 0 : index
    %6 = vector.load %arg1[%c0_5, %c1, %c0_6] : memref<2x12x8xf32, #tpu.memory_space<vmem>>, vector<2x8x8xf32>
    %7 = vector.shape_cast %6 : vector<2x8x8xf32> to vector<16x8xf32>
    %8 = arith.truncf %7 : vector<16x8xf32> to vector<16x8xbf16>
    %c1_7 = arith.constant 1 : index
    %c0_8 = arith.constant 0 : index
    %c0_9 = arith.constant 0 : index
    %9 = vector.load %arg2[%c1_7, %c0_8, %c0_9] : memref<5x8x8xbf16, #tpu.memory_space<vmem>>, vector<1x8x8xbf16>
    %10 = vector.shape_cast %9 : vector<1x8x8xbf16> to vector<8x8xbf16>
    %cst_10 = arith.constant dense<0.000000e+00> : vector<16x8xf32>
    %11 = tpu.matmul %8, %10, %cst_10 {dimension_numbers = #tpu.dot_dimension_numbers<[1], [0], [0], [1], [0, 0, 1, 1], [], []>} : vector<16x8xbf16>, vector<8x8xbf16>, vector<16x8xf32> -> vector<16x8xf32>
    %12 = arith.addf %5, %11 : vector<16x8xf32>
    %c0_11 = arith.constant 0 : index
    %c2 = arith.constant 2 : index
    %c0_12 = arith.constant 0 : index
    %13 = vector.load %arg1[%c0_11, %c2, %c0_12] : memref<2x12x8xf32, #tpu.memory_space<vmem>>, vector<2x8x8xf32>
    %14 = vector.shape_cast %13 : vector<2x8x8xf32> to vector<16x8xf32>
    %15 = arith.truncf %14 : vector<16x8xf32> to vector<16x8xbf16>
    %c2_13 = arith.constant 2 : index
    %c0_14 = arith.constant 0 : index
    %c0_15 = arith.constant 0 : index
    %16 = vector.load %arg2[%c2_13, %c0_14, %c0_15] : memref<5x8x8xbf16, #tpu.memory_space<vmem>>, vector<1x8x8xbf16>
    %17 = vector.shape_cast %16 : vector<1x8x8xbf16> to vector<8x8xbf16>
    %cst_16 = arith.constant dense<0.000000e+00> : vector<16x8xf32>
    %18 = tpu.matmul %15, %17, %cst_16 {dimension_numbers = #tpu.dot_dimension_numbers<[1], [0], [0], [1], [0, 0, 1, 1], [], []>} : vector<16x8xbf16>, vector<8x8xbf16>, vector<16x8xf32> -> vector<16x8xf32>
    %19 = arith.addf %12, %18 : vector<16x8xf32>
    %c0_17 = arith.constant 0 : index
    %c3 = arith.constant 3 : index
    %c0_18 = arith.constant 0 : index
    %20 = vector.load %arg1[%c0_17, %c3, %c0_18] : memref<2x12x8xf32, #tpu.memory_space<vmem>>, vector<2x8x8xf32>
    %21 = vector.shape_cast %20 : vector<2x8x8xf32> to vector<16x8xf32>
    %22 = arith.truncf %21 : vector<16x8xf32> to vector<16x8xbf16>
    %c3_19 = arith.constant 3 : index
    %c0_20 = arith.constant 0 : index
    %c0_21 = arith.constant 0 : index
    %23 = vector.load %arg2[%c3_19, %c0_20, %c0_21] : memref<5x8x8xbf16, #tpu.memory_space<vmem>>, vector<1x8x8xbf16>
    %24 = vector.shape_cast %23 : vector<1x8x8xbf16> to vector<8x8xbf16>
    %cst_22 = arith.constant dense<0.000000e+00> : vector<16x8xf32>
    %25 = tpu.matmul %22, %24, %cst_22 {dimension_numbers = #tpu.dot_dimension_numbers<[1], [0], [0], [1], [0, 0, 1, 1], [], []>} : vector<16x8xbf16>, vector<8x8xbf16>, vector<16x8xf32> -> vector<16x8xf32>
    %26 = arith.addf %19, %25 : vector<16x8xf32>
    %c0_23 = arith.constant 0 : index
    %c4 = arith.constant 4 : index
    %c0_24 = arith.constant 0 : index
    %27 = vector.load %arg1[%c0_23, %c4, %c0_24] : memref<2x12x8xf32, #tpu.memory_space<vmem>>, vector<2x8x8xf32>
    %28 = vector.shape_cast %27 : vector<2x8x8xf32> to vector<16x8xf32>
    %29 = arith.truncf %28 : vector<16x8xf32> to vector<16x8xbf16>
    %c4_25 = arith.constant 4 : index
    %c0_26 = arith.constant 0 : index
    %c0_27 = arith.constant 0 : index
    %30 = vector.load %arg2[%c4_25, %c0_26, %c0_27] : memref<5x8x8xbf16, #tpu.memory_space<vmem>>, vector<1x8x8xbf16>
    %31 = vector.shape_cast %30 : vector<1x8x8xbf16> to vector<8x8xbf16>
    %cst_28 = arith.constant dense<0.000000e+00> : vector<16x8xf32>
    %32 = tpu.matmul %29, %31, %cst_28 {dimension_numbers = #tpu.dot_dimension_numbers<[1], [0], [0], [1], [0, 0, 1, 1], [], []>} : vector<16x8xbf16>, vector<8x8xbf16>, vector<16x8xf32> -> vector<16x8xf32>
    %33 = arith.addf %26, %32 : vector<16x8xf32>
    %c0_29 = arith.constant 0 : index
    %c0_30 = arith.constant 0 : index
    %34 = vector.load %arg3[%c0_29, %c0_30] : memref<1x8xf32, #tpu.memory_space<vmem>>, vector<1x8xf32>
    %35 = vector.broadcast %34 : vector<1x8xf32> to vector<16x8xf32>
    %36 = arith.addf %33, %35 : vector<16x8xf32>
    %cst_31 = arith.constant 1.000000e-01 : f32
    %37 = vector.broadcast %cst_31 : f32 to vector<16x8xf32>
    %38 = arith.mulf %37, %36 : vector<16x8xf32>
    %39 = arith.maximumf %36, %38 : vector<16x8xf32>
    %40 = vector.shape_cast %39 : vector<16x8xf32> to vector<2x8x8xf32>
    %c0_32 = arith.constant 0 : index
    %c0_33 = arith.constant 0 : index
    %c0_34 = arith.constant 0 : index
    %41 = vector.load %arg4[%c0_32, %c0_33, %c0_34] : memref<2x8x8xf32, #tpu.memory_space<vmem>>, vector<2x8x8xf32>
    tpu.vector_store %arg4[%c0_32, %c0_33, %c0_34], %40 {strides = array<i32>} : memref<2x8x8xf32, #tpu.memory_space<vmem>>, vector<2x8x8xf32>,
    %cst_35 = arith.constant dense<0.000000e+00> : vector<8xf32>
    %42 = vector.multi_reduction <add>, %39, %cst_35 [0] : vector<16x8xf32> to vector<8xf32>
    %43 = vector.shape_cast %42 : vector<8xf32> to vector<1x8xf32>
    %44 = vector.shape_cast %43 : vector<1x8xf32> to vector<1x1x8xf32>
    %c0_36 = arith.constant 0 : index
    %c0_37 = arith.constant 0 : index
    %c0_38 = arith.constant 0 : index
    %45 = vector.load %arg5[%c0_36, %c0_37, %c0_38] : memref<1x1x8xf32, #tpu.memory_space<vmem>>, vector<1x1x8xf32>
    tpu.vector_store %arg5[%c0_36, %c0_37, %c0_38], %44 {strides = array<i32>} : memref<1x1x8xf32, #tpu.memory_space<vmem>>, vector<1x1x8xf32>,
    %46 = arith.mulf %39, %39 : vector<16x8xf32>
    %cst_39 = arith.constant dense<0.000000e+00> : vector<8xf32>
    %47 = vector.multi_reduction <add>, %46, %cst_39 [0] : vector<16x8xf32> to vector<8xf32>
    %48 = vector.shape_cast %47 : vector<8xf32> to vector<1x8xf32>
    %49 = vector.shape_cast %48 : vector<1x8xf32> to vector<1x1x8xf32>
    %c0_40 = arith.constant 0 : index
    %c0_41 = arith.constant 0 : index
    %c0_42 = arith.constant 0 : index
    %50 = vector.load %arg6[%c0_40, %c0_41, %c0_42] : memref<1x1x8xf32, #tpu.memory_space<vmem>>, vector<1x1x8xf32>
    tpu.vector_store %arg6[%c0_40, %c0_41, %c0_42], %49 {strides = array<i32>} : memref<1x1x8xf32, #tpu.memory_space<vmem>>, vector<1x1x8xf32>,
    return
  }
  func.func @transform_0(%arg0: i32) -> (i32, i32, i32) {
    %c0_i32 = arith.constant 0 : i32
    %c0_i32_0 = arith.constant 0 : i32
    %c0_i32_1 = arith.constant 0 : i32
    return %arg0, %c0_i32, %c0_i32_0 : i32, i32, i32
  }
  func.func @transform_1(%arg0: i32) -> (i32, i32, i32) {
    %c0_i32 = arith.constant 0 : i32
    %c0_i32_0 = arith.constant 0 : i32
    %c0_i32_1 = arith.constant 0 : i32
    %c0_i32_2 = arith.constant 0 : i32
    return %c0_i32, %c0_i32_0, %c0_i32_1 : i32, i32, i32
  }
  func.func @transform_2(%arg0: i32) -> (i32, i32) {
    %c0_i32 = arith.constant 0 : i32
    %c0_i32_0 = arith.constant 0 : i32
    %c0_i32_1 = arith.constant 0 : i32
    return %c0_i32, %c0_i32_0 : i32, i32
  }
  func.func @transform_3(%arg0: i32) -> (i32, i32, i32) {
    %c0_i32 = arith.constant 0 : i32
    %c0_i32_0 = arith.constant 0 : i32
    %c0_i32_1 = arith.constant 0 : i32
    return %arg0, %c0_i32, %c0_i32_0 : i32, i32, i32
  }
  func.func @transform_4(%arg0: i32) -> (i32, i32, i32) {
    %c0_i32 = arith.constant 0 : i32
    %c0_i32_0 = arith.constant 0 : i32
    %c0_i32_1 = arith.constant 0 : i32
    return %arg0, %c0_i32, %c0_i32_0 : i32, i32, i32
  }
  func.func @transform_5(%arg0: i32) -> (i32, i32, i32) {
    %c0_i32 = arith.constant 0 : i32
    %c0_i32_0 = arith.constant 0 : i32
    %c0_i32_1 = arith.constant 0 : i32
    return %arg0, %c0_i32, %c0_i32_0 : i32, i32, i32
  }
}

module attributes {stable_mosaic.version = 11 : i64} {
  func.func @_bn_pad_kernel(%arg0: i32, %arg1: memref<2x8x8xf32, #tpu.memory_space<vmem>>, %arg2: memref<1x1x8xf32, #tpu.memory_space<vmem>>, %arg3: memref<1x1x8xf32, #tpu.memory_space<vmem>>, %arg4: memref<1x8xf32, #tpu.memory_space<vmem>>, %arg5: memref<1x8xf32, #tpu.memory_space<vmem>>, %arg6: memref<2x12x8xf32, #tpu.memory_space<vmem>>) attributes {dimension_semantics = [#tpu.dimension_semantics<parallel>], iteration_bounds = array<i64: 1>, scalar_prefetch = 0 : i64, scratch_operands = 0 : i64, tpu.core_type = #tpu.core_type<tc>, window_params = [{transform_indices = @transform_0, window_bounds = array<i64: 2, 8, 8>}, {pipeline_mode = #tpu.pipeline_mode<synchronous>, transform_indices = @transform_1, window_bounds = array<i64: 1, 1, 8>}, {pipeline_mode = #tpu.pipeline_mode<synchronous>, transform_indices = @transform_2, window_bounds = array<i64: 1, 1, 8>}, {pipeline_mode = #tpu.pipeline_mode<synchronous>, transform_indices = @transform_3, window_bounds = array<i64: 1, 8>}, {pipeline_mode = #tpu.pipeline_mode<synchronous>, transform_indices = @transform_4, window_bounds = array<i64: 1, 8>}, {transform_indices = @transform_5, window_bounds = array<i64: 2, 12, 8>}]} {
    %c0 = arith.constant 0 : index
    %c0_0 = arith.constant 0 : index
    %c0_1 = arith.constant 0 : index
    %0 = vector.load %arg2[%c0, %c0_0, %c0_1] : memref<1x1x8xf32, #tpu.memory_space<vmem>>, vector<1x1x8xf32>
    %cst = arith.constant dense<0.000000e+00> : vector<1x8xf32>
    %1 = vector.multi_reduction <add>, %0, %cst [0] : vector<1x1x8xf32> to vector<1x8xf32>
    %c0_2 = arith.constant 0 : index
    %c0_3 = arith.constant 0 : index
    %c0_4 = arith.constant 0 : index
    %2 = vector.load %arg3[%c0_2, %c0_3, %c0_4] : memref<1x1x8xf32, #tpu.memory_space<vmem>>, vector<1x1x8xf32>
    %cst_5 = arith.constant dense<0.000000e+00> : vector<1x8xf32>
    %3 = vector.multi_reduction <add>, %2, %cst_5 [0] : vector<1x1x8xf32> to vector<1x8xf32>
    %cst_6 = arith.constant 6.250000e-02 : f32
    %4 = vector.broadcast %cst_6 : f32 to vector<1x8xf32>
    %5 = arith.mulf %1, %4 : vector<1x8xf32>
    %cst_7 = arith.constant 6.250000e-02 : f32
    %6 = vector.broadcast %cst_7 : f32 to vector<1x8xf32>
    %7 = arith.mulf %3, %6 : vector<1x8xf32>
    %8 = arith.mulf %5, %5 : vector<1x8xf32>
    %9 = arith.subf %7, %8 : vector<1x8xf32>
    %cst_8 = arith.constant 0.000000e+00 : f32
    %10 = vector.broadcast %cst_8 : f32 to vector<1x8xf32>
    %11 = arith.maximumf %9, %10 : vector<1x8xf32>
    %c0_9 = arith.constant 0 : index
    %c0_10 = arith.constant 0 : index
    %12 = vector.load %arg4[%c0_9, %c0_10] : memref<1x8xf32, #tpu.memory_space<vmem>>, vector<1x8xf32>
    %cst_11 = arith.constant 9.99999974E-6 : f32
    %13 = vector.broadcast %cst_11 : f32 to vector<1x8xf32>
    %14 = arith.addf %11, %13 : vector<1x8xf32>
    %15 = math.rsqrt %14 : vector<1x8xf32>
    %16 = arith.mulf %12, %15 : vector<1x8xf32>
    %c0_12 = arith.constant 0 : index
    %c0_13 = arith.constant 0 : index
    %17 = vector.load %arg5[%c0_12, %c0_13] : memref<1x8xf32, #tpu.memory_space<vmem>>, vector<1x8xf32>
    %18 = arith.mulf %5, %16 : vector<1x8xf32>
    %19 = arith.subf %17, %18 : vector<1x8xf32>
    %c0_14 = arith.constant 0 : index
    %c0_15 = arith.constant 0 : index
    %c0_16 = arith.constant 0 : index
    %20 = vector.load %arg1[%c0_14, %c0_15, %c0_16] : memref<2x8x8xf32, #tpu.memory_space<vmem>>, vector<2x8x8xf32>
    %21 = vector.shape_cast %16 : vector<1x8xf32> to vector<1x1x8xf32>
    %22 = vector.broadcast %21 : vector<1x1x8xf32> to vector<2x8x8xf32>
    %23 = arith.mulf %20, %22 : vector<2x8x8xf32>
    %24 = vector.shape_cast %19 : vector<1x8xf32> to vector<1x1x8xf32>
    %25 = vector.broadcast %24 : vector<1x1x8xf32> to vector<2x8x8xf32>
    %26 = arith.addf %23, %25 : vector<2x8x8xf32>
    %cst_17 = arith.constant 0.000000e+00 : f32
    %27 = vector.broadcast %cst_17 : f32 to vector<2x12x8xf32>
    %c0_18 = arith.constant 0 : index
    %c0_19 = arith.constant 0 : index
    %c0_20 = arith.constant 0 : index
    %28 = vector.load %arg6[%c0_18, %c0_19, %c0_20] : memref<2x12x8xf32, #tpu.memory_space<vmem>>, vector<2x12x8xf32>
    tpu.vector_store %arg6[%c0_18, %c0_19, %c0_20], %27 {strides = array<i32>} : memref<2x12x8xf32, #tpu.memory_space<vmem>>, vector<2x12x8xf32>,
    %c0_21 = arith.constant 0 : index
    %c2 = arith.constant 2 : index
    %c0_22 = arith.constant 0 : index
    %29 = vector.load %arg6[%c0_21, %c2, %c0_22] : memref<2x12x8xf32, #tpu.memory_space<vmem>>, vector<2x8x8xf32>
    tpu.vector_store %arg6[%c0_21, %c2, %c0_22], %26 {strides = array<i32>} : memref<2x12x8xf32, #tpu.memory_space<vmem>>, vector<2x8x8xf32>,
    return
  }
  func.func @transform_0(%arg0: i32) -> (i32, i32, i32) {
    %c0_i32 = arith.constant 0 : i32
    %c0_i32_0 = arith.constant 0 : i32
    %c0_i32_1 = arith.constant 0 : i32
    return %arg0, %c0_i32, %c0_i32_0 : i32, i32, i32
  }
  func.func @transform_1(%arg0: i32) -> (i32, i32, i32) {
    %c0_i32 = arith.constant 0 : i32
    %c0_i32_0 = arith.constant 0 : i32
    %c0_i32_1 = arith.constant 0 : i32
    %c0_i32_2 = arith.constant 0 : i32
    return %c0_i32, %c0_i32_0, %c0_i32_1 : i32, i32, i32
  }
  func.func @transform_2(%arg0: i32) -> (i32, i32, i32) {
    %c0_i32 = arith.constant 0 : i32
    %c0_i32_0 = arith.constant 0 : i32
    %c0_i32_1 = arith.constant 0 : i32
    %c0_i32_2 = arith.constant 0 : i32
    return %c0_i32, %c0_i32_0, %c0_i32_1 : i32, i32, i32
  }
  func.func @transform_3(%arg0: i32) -> (i32, i32) {
    %c0_i32 = arith.constant 0 : i32
    %c0_i32_0 = arith.constant 0 : i32
    %c0_i32_1 = arith.constant 0 : i32
    return %c0_i32, %c0_i32_0 : i32, i32
  }
  func.func @transform_4(%arg0: i32) -> (i32, i32) {
    %c0_i32 = arith.constant 0 : i32
    %c0_i32_0 = arith.constant 0 : i32
    %c0_i32_1 = arith.constant 0 : i32
    return %c0_i32, %c0_i32_0 : i32, i32
  }
  func.func @transform_5(%arg0: i32) -> (i32, i32, i32) {
    %c0_i32 = arith.constant 0 : i32
    %c0_i32_0 = arith.constant 0 : i32
    %c0_i32_1 = arith.constant 0 : i32
    return %arg0, %c0_i32, %c0_i32_0 : i32, i32, i32
  }
}

module attributes {stable_mosaic.version = 11 : i64} {
  func.func @_bn_dual_proj_kernel(%arg0: i32, %arg1: memref<16x16xf32, #tpu.memory_space<vmem>>, %arg2: memref<1x16xf32, #tpu.memory_space<vmem>>, %arg3: memref<1x16xf32, #tpu.memory_space<vmem>>, %arg4: memref<16x32xbf16, #tpu.memory_space<vmem>>, %arg5: memref<16x32xbf16, #tpu.memory_space<vmem>>, %arg6: memref<1x32xf32, #tpu.memory_space<vmem>>, %arg7: memref<16x32xf32, #tpu.memory_space<vmem>>, %arg8: memref<16x32xf32, #tpu.memory_space<vmem>>) attributes {dimension_semantics = [#tpu.dimension_semantics<parallel>], iteration_bounds = array<i64: 1>, scalar_prefetch = 0 : i64, scratch_operands = 0 : i64, tpu.core_type = #tpu.core_type<tc>, window_params = [{transform_indices = @transform_0, window_bounds = array<i64: 16, 16>}, {pipeline_mode = #tpu.pipeline_mode<synchronous>, transform_indices = @transform_1, window_bounds = array<i64: 1, 16>}, {pipeline_mode = #tpu.pipeline_mode<synchronous>, transform_indices = @transform_2, window_bounds = array<i64: 1, 16>}, {pipeline_mode = #tpu.pipeline_mode<synchronous>, transform_indices = @transform_3, window_bounds = array<i64: 16, 32>}, {pipeline_mode = #tpu.pipeline_mode<synchronous>, transform_indices = @transform_4, window_bounds = array<i64: 16, 32>}, {pipeline_mode = #tpu.pipeline_mode<synchronous>, transform_indices = @transform_5, window_bounds = array<i64: 1, 32>}, {transform_indices = @transform_6, window_bounds = array<i64: 16, 32>}, {transform_indices = @transform_7, window_bounds = array<i64: 16, 32>}]} {
    %c0 = arith.constant 0 : index
    %c0_0 = arith.constant 0 : index
    %0 = vector.load %arg1[%c0, %c0_0] : memref<16x16xf32, #tpu.memory_space<vmem>>, vector<16x16xf32>
    %c0_1 = arith.constant 0 : index
    %c0_2 = arith.constant 0 : index
    %1 = vector.load %arg2[%c0_1, %c0_2] : memref<1x16xf32, #tpu.memory_space<vmem>>, vector<1x16xf32>
    %2 = vector.broadcast %1 : vector<1x16xf32> to vector<16x16xf32>
    %3 = arith.mulf %0, %2 : vector<16x16xf32>
    %c0_3 = arith.constant 0 : index
    %c0_4 = arith.constant 0 : index
    %4 = vector.load %arg3[%c0_3, %c0_4] : memref<1x16xf32, #tpu.memory_space<vmem>>, vector<1x16xf32>
    %5 = vector.broadcast %4 : vector<1x16xf32> to vector<16x16xf32>
    %6 = arith.addf %3, %5 : vector<16x16xf32>
    %7 = arith.truncf %6 : vector<16x16xf32> to vector<16x16xbf16>
    %c0_5 = arith.constant 0 : index
    %c0_6 = arith.constant 0 : index
    %8 = vector.load %arg4[%c0_5, %c0_6] : memref<16x32xbf16, #tpu.memory_space<vmem>>, vector<16x32xbf16>
    %cst = arith.constant dense<0.000000e+00> : vector<16x32xf32>
    %9 = tpu.matmul %7, %8, %cst {dimension_numbers = #tpu.dot_dimension_numbers<[1], [0], [0], [1], [0, 0, 1, 1], [], []>} : vector<16x16xbf16>, vector<16x32xbf16>, vector<16x32xf32> -> vector<16x32xf32>
    %c0_7 = arith.constant 0 : index
    %c0_8 = arith.constant 0 : index
    %10 = vector.load %arg6[%c0_7, %c0_8] : memref<1x32xf32, #tpu.memory_space<vmem>>, vector<1x32xf32>
    %11 = vector.broadcast %10 : vector<1x32xf32> to vector<16x32xf32>
    %12 = arith.addf %9, %11 : vector<16x32xf32>
    %c0_9 = arith.constant 0 : index
    %c0_10 = arith.constant 0 : index
    %13 = vector.load %arg7[%c0_9, %c0_10] : memref<16x32xf32, #tpu.memory_space<vmem>>, vector<16x32xf32>
    tpu.vector_store %arg7[%c0_9, %c0_10], %12 {strides = array<i32>} : memref<16x32xf32, #tpu.memory_space<vmem>>, vector<16x32xf32>,
    %c0_11 = arith.constant 0 : index
    %c0_12 = arith.constant 0 : index
    %14 = vector.load %arg5[%c0_11, %c0_12] : memref<16x32xbf16, #tpu.memory_space<vmem>>, vector<16x32xbf16>
    %cst_13 = arith.constant dense<0.000000e+00> : vector<16x32xf32>
    %15 = tpu.matmul %7, %14, %cst_13 {dimension_numbers = #tpu.dot_dimension_numbers<[1], [0], [0], [1], [0, 0, 1, 1], [], []>} : vector<16x16xbf16>, vector<16x32xbf16>, vector<16x32xf32> -> vector<16x32xf32>
    %c0_14 = arith.constant 0 : index
    %c0_15 = arith.constant 0 : index
    %16 = vector.load %arg8[%c0_14, %c0_15] : memref<16x32xf32, #tpu.memory_space<vmem>>, vector<16x32xf32>
    tpu.vector_store %arg8[%c0_14, %c0_15], %15 {strides = array<i32>} : memref<16x32xf32, #tpu.memory_space<vmem>>, vector<16x32xf32>,
    return
  }
  func.func @transform_0(%arg0: i32) -> (i32, i32) {
    %c0_i32 = arith.constant 0 : i32
    %c0_i32_0 = arith.constant 0 : i32
    return %arg0, %c0_i32 : i32, i32
  }
  func.func @transform_1(%arg0: i32) -> (i32, i32) {
    %c0_i32 = arith.constant 0 : i32
    %c0_i32_0 = arith.constant 0 : i32
    %c0_i32_1 = arith.constant 0 : i32
    return %c0_i32, %c0_i32_0 : i32, i32
  }
  func.func @transform_2(%arg0: i32) -> (i32, i32) {
    %c0_i32 = arith.constant 0 : i32
    %c0_i32_0 = arith.constant 0 : i32
    %c0_i32_1 = arith.constant 0 : i32
    return %c0_i32, %c0_i32_0 : i32, i32
  }
  func.func @transform_3(%arg0: i32) -> (i32, i32) {
    %c0_i32 = arith.constant 0 : i32
    %c0_i32_0 = arith.constant 0 : i32
    %c0_i32_1 = arith.constant 0 : i32
    return %c0_i32, %c0_i32_0 : i32, i32
  }
  func.func @transform_4(%arg0: i32) -> (i32, i32) {
    %c0_i32 = arith.constant 0 : i32
    %c0_i32_0 = arith.constant 0 : i32
    %c0_i32_1 = arith.constant 0 : i32
    return %c0_i32, %c0_i32_0 : i32, i32
  }
  func.func @transform_5(%arg0: i32) -> (i32, i32) {
    %c0_i32 = arith.constant 0 : i32
    %c0_i32_0 = arith.constant 0 : i32
    %c0_i32_1 = arith.constant 0 : i32
    return %c0_i32, %c0_i32_0 : i32, i32
  }
  func.func @transform_6(%arg0: i32) -> (i32, i32) {
    %c0_i32 = arith.constant 0 : i32
    %c0_i32_0 = arith.constant 0 : i32
    return %arg0, %c0_i32 : i32, i32
  }
  func.func @transform_7(%arg0: i32) -> (i32, i32) {
    %c0_i32 = arith.constant 0 : i32
    %c0_i32_0 = arith.constant 0 : i32
    return %arg0, %c0_i32 : i32, i32
  }
}

module attributes {stable_mosaic.version = 11 : i64} {
  func.func @_pair_mlp_kernel(%arg0: i32, %arg1: i32, %arg2: i32, %arg3: memref<1x8x32xf32, #tpu.memory_space<vmem>>, %arg4: memref<1x8x32xf32, #tpu.memory_space<vmem>>, %arg5: memref<32x32xbf16, #tpu.memory_space<vmem>>, %arg6: memref<1x32xf32, #tpu.memory_space<vmem>>, %arg7: memref<32x32xbf16, #tpu.memory_space<vmem>>, %arg8: memref<1x32xf32, #tpu.memory_space<vmem>>, %arg9: memref<32x32xbf16, #tpu.memory_space<vmem>>, %arg10: memref<1x32xf32, #tpu.memory_space<vmem>>, %arg11: memref<32x32xbf16, #tpu.memory_space<vmem>>, %arg12: memref<1x32xf32, #tpu.memory_space<vmem>>, %arg13: memref<32x16xbf16, #tpu.memory_space<vmem>>, %arg14: memref<1x16xf32, #tpu.memory_space<vmem>>, %arg15: memref<1x8x16xf32, #tpu.memory_space<vmem>>, %arg16: memref<8x32xf32, #tpu.memory_space<vmem>>) attributes {dimension_semantics = [#tpu.dimension_semantics<parallel>, #tpu.dimension_semantics<parallel>, #tpu.dimension_semantics<arbitrary>], iteration_bounds = array<i64: 2, 1, 1>, scalar_prefetch = 0 : i64, scratch_operands = 1 : i64, tpu.core_type = #tpu.core_type<tc>, window_params = [{transform_indices = @transform_0, window_bounds = array<i64: 1, 8, 32>}, {transform_indices = @transform_1, window_bounds = array<i64: 1, 8, 32>}, {pipeline_mode = #tpu.pipeline_mode<synchronous>, transform_indices = @transform_2, window_bounds = array<i64: 32, 32>}, {pipeline_mode = #tpu.pipeline_mode<synchronous>, transform_indices = @transform_3, window_bounds = array<i64: 1, 32>}, {pipeline_mode = #tpu.pipeline_mode<synchronous>, transform_indices = @transform_4, window_bounds = array<i64: 32, 32>}, {pipeline_mode = #tpu.pipeline_mode<synchronous>, transform_indices = @transform_5, window_bounds = array<i64: 1, 32>}, {pipeline_mode = #tpu.pipeline_mode<synchronous>, transform_indices = @transform_6, window_bounds = array<i64: 32, 32>}, {pipeline_mode = #tpu.pipeline_mode<synchronous>, transform_indices = @transform_7, window_bounds = array<i64: 1, 32>}, {pipeline_mode = #tpu.pipeline_mode<synchronous>, transform_indices = @transform_8, window_bounds = array<i64: 32, 32>}, {pipeline_mode = #tpu.pipeline_mode<synchronous>, transform_indices = @transform_9, window_bounds = array<i64: 1, 32>}, {pipeline_mode = #tpu.pipeline_mode<synchronous>, transform_indices = @transform_10, window_bounds = array<i64: 32, 16>}, {pipeline_mode = #tpu.pipeline_mode<synchronous>, transform_indices = @transform_11, window_bounds = array<i64: 1, 16>}, {transform_indices = @transform_12, window_bounds = array<i64: 1, 8, 16>}]} {
    %c0_i32 = arith.constant 0 : i32
    %0 = arith.cmpi eq, %arg2, %c0_i32 : i32
    %1 = arith.extui %0 : i1 to i32
    %c0_i32_0 = arith.constant 0 : i32
    %2 = arith.cmpi ne, %1, %c0_i32_0 : i32
    scf.if %2 {
      %cst_94 = arith.constant 0.000000e+00 : f32
      %258 = vector.broadcast %cst_94 : f32 to vector<8x32xf32>
      %c0_95 = arith.constant 0 : index
      %c0_96 = arith.constant 0 : index
      %259 = vector.load %arg16[%c0_95, %c0_96] : memref<8x32xf32, #tpu.memory_space<vmem>>, vector<8x32xf32>
      tpu.vector_store %arg16[%c0_95, %c0_96], %258 {strides = array<i32>} : memref<8x32xf32, #tpu.memory_space<vmem>>, vector<8x32xf32>,
    } else {
    }
    %c0 = arith.constant 0 : index
    %c0_1 = arith.constant 0 : index
    %c0_2 = arith.constant 0 : index
    %3 = vector.load %arg3[%c0, %c0_1, %c0_2] : memref<1x8x32xf32, #tpu.memory_space<vmem>>, vector<1x8x32xf32>
    %4 = vector.shape_cast %3 : vector<1x8x32xf32> to vector<8x32xf32>
    %c0_3 = arith.constant 0 : index
    %c0_4 = arith.constant 0 : index
    %5 = vector.load %arg5[%c0_3, %c0_4] : memref<32x32xbf16, #tpu.memory_space<vmem>>, vector<32x32xbf16>
    %c0_5 = arith.constant 0 : index
    %c0_6 = arith.constant 0 : index
    %6 = vector.load %arg7[%c0_5, %c0_6] : memref<32x32xbf16, #tpu.memory_space<vmem>>, vector<32x32xbf16>
    %c0_7 = arith.constant 0 : index
    %c0_8 = arith.constant 0 : index
    %7 = vector.load %arg9[%c0_7, %c0_8] : memref<32x32xbf16, #tpu.memory_space<vmem>>, vector<32x32xbf16>
    %c0_9 = arith.constant 0 : index
    %c0_10 = arith.constant 0 : index
    %8 = vector.load %arg6[%c0_9, %c0_10] : memref<1x32xf32, #tpu.memory_space<vmem>>, vector<1x32xf32>
    %c0_11 = arith.constant 0 : index
    %c0_12 = arith.constant 0 : index
    %9 = vector.load %arg8[%c0_11, %c0_12] : memref<1x32xf32, #tpu.memory_space<vmem>>, vector<1x32xf32>
    %c0_13 = arith.constant 0 : index
    %c0_14 = arith.constant 0 : index
    %10 = vector.load %arg10[%c0_13, %c0_14] : memref<1x32xf32, #tpu.memory_space<vmem>>, vector<1x32xf32>
    %c0_15 = arith.constant 0 : index
    %c0_16 = arith.constant 0 : index
    %11 = vector.load %arg16[%c0_15, %c0_16] : memref<8x32xf32, #tpu.memory_space<vmem>>, vector<8x32xf32>
    %cst = arith.constant 0.000000e+00 : f32
    %12 = vector.broadcast %cst : f32 to vector<8x32xf32>
    %c0_i32_17 = arith.constant 0 : i32
    %c0_18 = arith.constant 0 : index
    %13 = arith.index_cast %c0_i32_17 : i32 to index
    %c0_19 = arith.constant 0 : index
    %14 = vector.load %arg4[%c0_18, %13, %c0_19] : memref<1x8x32xf32, #tpu.memory_space<vmem>>, vector<1x1x32xf32>
    %15 = vector.shape_cast %14 : vector<1x1x32xf32> to vector<1x32xf32>
    %16 = vector.broadcast %15 : vector<1x32xf32> to vector<8x32xf32>
    %17 = arith.addf %4, %16 : vector<8x32xf32>
    %cst_20 = arith.constant 1.000000e-01 : f32
    %18 = vector.broadcast %cst_20 : f32 to vector<8x32xf32>
    %19 = arith.mulf %18, %17 : vector<8x32xf32>
    %20 = arith.maximumf %17, %19 : vector<8x32xf32>
    %21 = arith.truncf %20 : vector<8x32xf32> to vector<8x32xbf16>
    %cst_21 = arith.constant dense<0.000000e+00> : vector<8x32xf32>
    %22 = tpu.matmul %21, %5, %cst_21 {dimension_numbers = #tpu.dot_dimension_numbers<[1], [0], [0], [1], [0, 0, 1, 1], [], []>} : vector<8x32xbf16>, vector<32x32xbf16>, vector<8x32xf32> -> vector<8x32xf32>
    %23 = vector.broadcast %8 : vector<1x32xf32> to vector<8x32xf32>
    %24 = arith.addf %22, %23 : vector<8x32xf32>
    %cst_22 = arith.constant 1.000000e-01 : f32
    %25 = vector.broadcast %cst_22 : f32 to vector<8x32xf32>
    %26 = arith.mulf %25, %24 : vector<8x32xf32>
    %27 = arith.maximumf %24, %26 : vector<8x32xf32>
    %28 = arith.truncf %27 : vector<8x32xf32> to vector<8x32xbf16>
    %cst_23 = arith.constant dense<0.000000e+00> : vector<8x32xf32>
    %29 = tpu.matmul %28, %6, %cst_23 {dimension_numbers = #tpu.dot_dimension_numbers<[1], [0], [0], [1], [0, 0, 1, 1], [], []>} : vector<8x32xbf16>, vector<32x32xbf16>, vector<8x32xf32> -> vector<8x32xf32>
    %30 = vector.broadcast %9 : vector<1x32xf32> to vector<8x32xf32>
    %31 = arith.addf %29, %30 : vector<8x32xf32>
    %cst_24 = arith.constant 1.000000e-01 : f32
    %32 = vector.broadcast %cst_24 : f32 to vector<8x32xf32>
    %33 = arith.mulf %32, %31 : vector<8x32xf32>
    %34 = arith.maximumf %31, %33 : vector<8x32xf32>
    %35 = arith.truncf %34 : vector<8x32xf32> to vector<8x32xbf16>
    %cst_25 = arith.constant dense<0.000000e+00> : vector<8x32xf32>
    %36 = tpu.matmul %35, %7, %cst_25 {dimension_numbers = #tpu.dot_dimension_numbers<[1], [0], [0], [1], [0, 0, 1, 1], [], []>} : vector<8x32xbf16>, vector<32x32xbf16>, vector<8x32xf32> -> vector<8x32xf32>
    %37 = vector.broadcast %10 : vector<1x32xf32> to vector<8x32xf32>
    %38 = arith.addf %36, %37 : vector<8x32xf32>
    %cst_26 = arith.constant 1.000000e-01 : f32
    %39 = vector.broadcast %cst_26 : f32 to vector<8x32xf32>
    %40 = arith.mulf %39, %38 : vector<8x32xf32>
    %41 = arith.maximumf %38, %40 : vector<8x32xf32>
    %42 = arith.addf %12, %41 : vector<8x32xf32>
    %c1_i32 = arith.constant 1 : i32
    %c0_27 = arith.constant 0 : index
    %43 = arith.index_cast %c1_i32 : i32 to index
    %c0_28 = arith.constant 0 : index
    %44 = vector.load %arg4[%c0_27, %43, %c0_28] : memref<1x8x32xf32, #tpu.memory_space<vmem>>, vector<1x1x32xf32>
    %45 = vector.shape_cast %44 : vector<1x1x32xf32> to vector<1x32xf32>
    %46 = vector.broadcast %45 : vector<1x32xf32> to vector<8x32xf32>
    %47 = arith.addf %4, %46 : vector<8x32xf32>
    %cst_29 = arith.constant 1.000000e-01 : f32
    %48 = vector.broadcast %cst_29 : f32 to vector<8x32xf32>
    %49 = arith.mulf %48, %47 : vector<8x32xf32>
    %50 = arith.maximumf %47, %49 : vector<8x32xf32>
    %51 = arith.truncf %50 : vector<8x32xf32> to vector<8x32xbf16>
    %cst_30 = arith.constant dense<0.000000e+00> : vector<8x32xf32>
    %52 = tpu.matmul %51, %5, %cst_30 {dimension_numbers = #tpu.dot_dimension_numbers<[1], [0], [0], [1], [0, 0, 1, 1], [], []>} : vector<8x32xbf16>, vector<32x32xbf16>, vector<8x32xf32> -> vector<8x32xf32>
    %53 = vector.broadcast %8 : vector<1x32xf32> to vector<8x32xf32>
    %54 = arith.addf %52, %53 : vector<8x32xf32>
    %cst_31 = arith.constant 1.000000e-01 : f32
    %55 = vector.broadcast %cst_31 : f32 to vector<8x32xf32>
    %56 = arith.mulf %55, %54 : vector<8x32xf32>
    %57 = arith.maximumf %54, %56 : vector<8x32xf32>
    %58 = arith.truncf %57 : vector<8x32xf32> to vector<8x32xbf16>
    %cst_32 = arith.constant dense<0.000000e+00> : vector<8x32xf32>
    %59 = tpu.matmul %58, %6, %cst_32 {dimension_numbers = #tpu.dot_dimension_numbers<[1], [0], [0], [1], [0, 0, 1, 1], [], []>} : vector<8x32xbf16>, vector<32x32xbf16>, vector<8x32xf32> -> vector<8x32xf32>
    %60 = vector.broadcast %9 : vector<1x32xf32> to vector<8x32xf32>
    %61 = arith.addf %59, %60 : vector<8x32xf32>
    %cst_33 = arith.constant 1.000000e-01 : f32
    %62 = vector.broadcast %cst_33 : f32 to vector<8x32xf32>
    %63 = arith.mulf %62, %61 : vector<8x32xf32>
    %64 = arith.maximumf %61, %63 : vector<8x32xf32>
    %65 = arith.truncf %64 : vector<8x32xf32> to vector<8x32xbf16>
    %cst_34 = arith.constant dense<0.000000e+00> : vector<8x32xf32>
    %66 = tpu.matmul %65, %7, %cst_34 {dimension_numbers = #tpu.dot_dimension_numbers<[1], [0], [0], [1], [0, 0, 1, 1], [], []>} : vector<8x32xbf16>, vector<32x32xbf16>, vector<8x32xf32> -> vector<8x32xf32>
    %67 = vector.broadcast %10 : vector<1x32xf32> to vector<8x32xf32>
    %68 = arith.addf %66, %67 : vector<8x32xf32>
    %cst_35 = arith.constant 1.000000e-01 : f32
    %69 = vector.broadcast %cst_35 : f32 to vector<8x32xf32>
    %70 = arith.mulf %69, %68 : vector<8x32xf32>
    %71 = arith.maximumf %68, %70 : vector<8x32xf32>
    %72 = arith.addf %42, %71 : vector<8x32xf32>
    %c2_i32 = arith.constant 2 : i32
    %c0_36 = arith.constant 0 : index
    %73 = arith.index_cast %c2_i32 : i32 to index
    %c0_37 = arith.constant 0 : index
    %74 = vector.load %arg4[%c0_36, %73, %c0_37] : memref<1x8x32xf32, #tpu.memory_space<vmem>>, vector<1x1x32xf32>
    %75 = vector.shape_cast %74 : vector<1x1x32xf32> to vector<1x32xf32>
    %76 = vector.broadcast %75 : vector<1x32xf32> to vector<8x32xf32>
    %77 = arith.addf %4, %76 : vector<8x32xf32>
    %cst_38 = arith.constant 1.000000e-01 : f32
    %78 = vector.broadcast %cst_38 : f32 to vector<8x32xf32>
    %79 = arith.mulf %78, %77 : vector<8x32xf32>
    %80 = arith.maximumf %77, %79 : vector<8x32xf32>
    %81 = arith.truncf %80 : vector<8x32xf32> to vector<8x32xbf16>
    %cst_39 = arith.constant dense<0.000000e+00> : vector<8x32xf32>
    %82 = tpu.matmul %81, %5, %cst_39 {dimension_numbers = #tpu.dot_dimension_numbers<[1], [0], [0], [1], [0, 0, 1, 1], [], []>} : vector<8x32xbf16>, vector<32x32xbf16>, vector<8x32xf32> -> vector<8x32xf32>
    %83 = vector.broadcast %8 : vector<1x32xf32> to vector<8x32xf32>
    %84 = arith.addf %82, %83 : vector<8x32xf32>
    %cst_40 = arith.constant 1.000000e-01 : f32
    %85 = vector.broadcast %cst_40 : f32 to vector<8x32xf32>
    %86 = arith.mulf %85, %84 : vector<8x32xf32>
    %87 = arith.maximumf %84, %86 : vector<8x32xf32>
    %88 = arith.truncf %87 : vector<8x32xf32> to vector<8x32xbf16>
    %cst_41 = arith.constant dense<0.000000e+00> : vector<8x32xf32>
    %89 = tpu.matmul %88, %6, %cst_41 {dimension_numbers = #tpu.dot_dimension_numbers<[1], [0], [0], [1], [0, 0, 1, 1], [], []>} : vector<8x32xbf16>, vector<32x32xbf16>, vector<8x32xf32> -> vector<8x32xf32>
    %90 = vector.broadcast %9 : vector<1x32xf32> to vector<8x32xf32>
    %91 = arith.addf %89, %90 : vector<8x32xf32>
    %cst_42 = arith.constant 1.000000e-01 : f32
    %92 = vector.broadcast %cst_42 : f32 to vector<8x32xf32>
    %93 = arith.mulf %92, %91 : vector<8x32xf32>
    %94 = arith.maximumf %91, %93 : vector<8x32xf32>
    %95 = arith.truncf %94 : vector<8x32xf32> to vector<8x32xbf16>
    %cst_43 = arith.constant dense<0.000000e+00> : vector<8x32xf32>
    %96 = tpu.matmul %95, %7, %cst_43 {dimension_numbers = #tpu.dot_dimension_numbers<[1], [0], [0], [1], [0, 0, 1, 1], [], []>} : vector<8x32xbf16>, vector<32x32xbf16>, vector<8x32xf32> -> vector<8x32xf32>
    %97 = vector.broadcast %10 : vector<1x32xf32> to vector<8x32xf32>
    %98 = arith.addf %96, %97 : vector<8x32xf32>
    %cst_44 = arith.constant 1.000000e-01 : f32
    %99 = vector.broadcast %cst_44 : f32 to vector<8x32xf32>
    %100 = arith.mulf %99, %98 : vector<8x32xf32>
    %101 = arith.maximumf %98, %100 : vector<8x32xf32>
    %102 = arith.addf %72, %101 : vector<8x32xf32>
    %c3_i32 = arith.constant 3 : i32
    %c0_45 = arith.constant 0 : index
    %103 = arith.index_cast %c3_i32 : i32 to index
    %c0_46 = arith.constant 0 : index
    %104 = vector.load %arg4[%c0_45, %103, %c0_46] : memref<1x8x32xf32, #tpu.memory_space<vmem>>, vector<1x1x32xf32>
    %105 = vector.shape_cast %104 : vector<1x1x32xf32> to vector<1x32xf32>
    %106 = vector.broadcast %105 : vector<1x32xf32> to vector<8x32xf32>
    %107 = arith.addf %4, %106 : vector<8x32xf32>
    %cst_47 = arith.constant 1.000000e-01 : f32
    %108 = vector.broadcast %cst_47 : f32 to vector<8x32xf32>
    %109 = arith.mulf %108, %107 : vector<8x32xf32>
    %110 = arith.maximumf %107, %109 : vector<8x32xf32>
    %111 = arith.truncf %110 : vector<8x32xf32> to vector<8x32xbf16>
    %cst_48 = arith.constant dense<0.000000e+00> : vector<8x32xf32>
    %112 = tpu.matmul %111, %5, %cst_48 {dimension_numbers = #tpu.dot_dimension_numbers<[1], [0], [0], [1], [0, 0, 1, 1], [], []>} : vector<8x32xbf16>, vector<32x32xbf16>, vector<8x32xf32> -> vector<8x32xf32>
    %113 = vector.broadcast %8 : vector<1x32xf32> to vector<8x32xf32>
    %114 = arith.addf %112, %113 : vector<8x32xf32>
    %cst_49 = arith.constant 1.000000e-01 : f32
    %115 = vector.broadcast %cst_49 : f32 to vector<8x32xf32>
    %116 = arith.mulf %115, %114 : vector<8x32xf32>
    %117 = arith.maximumf %114, %116 : vector<8x32xf32>
    %118 = arith.truncf %117 : vector<8x32xf32> to vector<8x32xbf16>
    %cst_50 = arith.constant dense<0.000000e+00> : vector<8x32xf32>
    %119 = tpu.matmul %118, %6, %cst_50 {dimension_numbers = #tpu.dot_dimension_numbers<[1], [0], [0], [1], [0, 0, 1, 1], [], []>} : vector<8x32xbf16>, vector<32x32xbf16>, vector<8x32xf32> -> vector<8x32xf32>
    %120 = vector.broadcast %9 : vector<1x32xf32> to vector<8x32xf32>
    %121 = arith.addf %119, %120 : vector<8x32xf32>
    %cst_51 = arith.constant 1.000000e-01 : f32
    %122 = vector.broadcast %cst_51 : f32 to vector<8x32xf32>
    %123 = arith.mulf %122, %121 : vector<8x32xf32>
    %124 = arith.maximumf %121, %123 : vector<8x32xf32>
    %125 = arith.truncf %124 : vector<8x32xf32> to vector<8x32xbf16>
    %cst_52 = arith.constant dense<0.000000e+00> : vector<8x32xf32>
    %126 = tpu.matmul %125, %7, %cst_52 {dimension_numbers = #tpu.dot_dimension_numbers<[1], [0], [0], [1], [0, 0, 1, 1], [], []>} : vector<8x32xbf16>, vector<32x32xbf16>, vector<8x32xf32> -> vector<8x32xf32>
    %127 = vector.broadcast %10 : vector<1x32xf32> to vector<8x32xf32>
    %128 = arith.addf %126, %127 : vector<8x32xf32>
    %cst_53 = arith.constant 1.000000e-01 : f32
    %129 = vector.broadcast %cst_53 : f32 to vector<8x32xf32>
    %130 = arith.mulf %129, %128 : vector<8x32xf32>
    %131 = arith.maximumf %128, %130 : vector<8x32xf32>
    %132 = arith.addf %102, %131 : vector<8x32xf32>
    %c4_i32 = arith.constant 4 : i32
    %c0_54 = arith.constant 0 : index
    %133 = arith.index_cast %c4_i32 : i32 to index
    %c0_55 = arith.constant 0 : index
    %134 = vector.load %arg4[%c0_54, %133, %c0_55] : memref<1x8x32xf32, #tpu.memory_space<vmem>>, vector<1x1x32xf32>
    %135 = vector.shape_cast %134 : vector<1x1x32xf32> to vector<1x32xf32>
    %136 = vector.broadcast %135 : vector<1x32xf32> to vector<8x32xf32>
    %137 = arith.addf %4, %136 : vector<8x32xf32>
    %cst_56 = arith.constant 1.000000e-01 : f32
    %138 = vector.broadcast %cst_56 : f32 to vector<8x32xf32>
    %139 = arith.mulf %138, %137 : vector<8x32xf32>
    %140 = arith.maximumf %137, %139 : vector<8x32xf32>
    %141 = arith.truncf %140 : vector<8x32xf32> to vector<8x32xbf16>
    %cst_57 = arith.constant dense<0.000000e+00> : vector<8x32xf32>
    %142 = tpu.matmul %141, %5, %cst_57 {dimension_numbers = #tpu.dot_dimension_numbers<[1], [0], [0], [1], [0, 0, 1, 1], [], []>} : vector<8x32xbf16>, vector<32x32xbf16>, vector<8x32xf32> -> vector<8x32xf32>
    %143 = vector.broadcast %8 : vector<1x32xf32> to vector<8x32xf32>
    %144 = arith.addf %142, %143 : vector<8x32xf32>
    %cst_58 = arith.constant 1.000000e-01 : f32
    %145 = vector.broadcast %cst_58 : f32 to vector<8x32xf32>
    %146 = arith.mulf %145, %144 : vector<8x32xf32>
    %147 = arith.maximumf %144, %146 : vector<8x32xf32>
    %148 = arith.truncf %147 : vector<8x32xf32> to vector<8x32xbf16>
    %cst_59 = arith.constant dense<0.000000e+00> : vector<8x32xf32>
    %149 = tpu.matmul %148, %6, %cst_59 {dimension_numbers = #tpu.dot_dimension_numbers<[1], [0], [0], [1], [0, 0, 1, 1], [], []>} : vector<8x32xbf16>, vector<32x32xbf16>, vector<8x32xf32> -> vector<8x32xf32>
    %150 = vector.broadcast %9 : vector<1x32xf32> to vector<8x32xf32>
    %151 = arith.addf %149, %150 : vector<8x32xf32>
    %cst_60 = arith.constant 1.000000e-01 : f32
    %152 = vector.broadcast %cst_60 : f32 to vector<8x32xf32>
    %153 = arith.mulf %152, %151 : vector<8x32xf32>
    %154 = arith.maximumf %151, %153 : vector<8x32xf32>
    %155 = arith.truncf %154 : vector<8x32xf32> to vector<8x32xbf16>
    %cst_61 = arith.constant dense<0.000000e+00> : vector<8x32xf32>
    %156 = tpu.matmul %155, %7, %cst_61 {dimension_numbers = #tpu.dot_dimension_numbers<[1], [0], [0], [1], [0, 0, 1, 1], [], []>} : vector<8x32xbf16>, vector<32x32xbf16>, vector<8x32xf32> -> vector<8x32xf32>
    %157 = vector.broadcast %10 : vector<1x32xf32> to vector<8x32xf32>
    %158 = arith.addf %156, %157 : vector<8x32xf32>
    %cst_62 = arith.constant 1.000000e-01 : f32
    %159 = vector.broadcast %cst_62 : f32 to vector<8x32xf32>
    %160 = arith.mulf %159, %158 : vector<8x32xf32>
    %161 = arith.maximumf %158, %160 : vector<8x32xf32>
    %162 = arith.addf %132, %161 : vector<8x32xf32>
    %c5_i32 = arith.constant 5 : i32
    %c0_63 = arith.constant 0 : index
    %163 = arith.index_cast %c5_i32 : i32 to index
    %c0_64 = arith.constant 0 : index
    %164 = vector.load %arg4[%c0_63, %163, %c0_64] : memref<1x8x32xf32, #tpu.memory_space<vmem>>, vector<1x1x32xf32>
    %165 = vector.shape_cast %164 : vector<1x1x32xf32> to vector<1x32xf32>
    %166 = vector.broadcast %165 : vector<1x32xf32> to vector<8x32xf32>
    %167 = arith.addf %4, %166 : vector<8x32xf32>
    %cst_65 = arith.constant 1.000000e-01 : f32
    %168 = vector.broadcast %cst_65 : f32 to vector<8x32xf32>
    %169 = arith.mulf %168, %167 : vector<8x32xf32>
    %170 = arith.maximumf %167, %169 : vector<8x32xf32>
    %171 = arith.truncf %170 : vector<8x32xf32> to vector<8x32xbf16>
    %cst_66 = arith.constant dense<0.000000e+00> : vector<8x32xf32>
    %172 = tpu.matmul %171, %5, %cst_66 {dimension_numbers = #tpu.dot_dimension_numbers<[1], [0], [0], [1], [0, 0, 1, 1], [], []>} : vector<8x32xbf16>, vector<32x32xbf16>, vector<8x32xf32> -> vector<8x32xf32>
    %173 = vector.broadcast %8 : vector<1x32xf32> to vector<8x32xf32>
    %174 = arith.addf %172, %173 : vector<8x32xf32>
    %cst_67 = arith.constant 1.000000e-01 : f32
    %175 = vector.broadcast %cst_67 : f32 to vector<8x32xf32>
    %176 = arith.mulf %175, %174 : vector<8x32xf32>
    %177 = arith.maximumf %174, %176 : vector<8x32xf32>
    %178 = arith.truncf %177 : vector<8x32xf32> to vector<8x32xbf16>
    %cst_68 = arith.constant dense<0.000000e+00> : vector<8x32xf32>
    %179 = tpu.matmul %178, %6, %cst_68 {dimension_numbers = #tpu.dot_dimension_numbers<[1], [0], [0], [1], [0, 0, 1, 1], [], []>} : vector<8x32xbf16>, vector<32x32xbf16>, vector<8x32xf32> -> vector<8x32xf32>
    %180 = vector.broadcast %9 : vector<1x32xf32> to vector<8x32xf32>
    %181 = arith.addf %179, %180 : vector<8x32xf32>
    %cst_69 = arith.constant 1.000000e-01 : f32
    %182 = vector.broadcast %cst_69 : f32 to vector<8x32xf32>
    %183 = arith.mulf %182, %181 : vector<8x32xf32>
    %184 = arith.maximumf %181, %183 : vector<8x32xf32>
    %185 = arith.truncf %184 : vector<8x32xf32> to vector<8x32xbf16>
    %cst_70 = arith.constant dense<0.000000e+00> : vector<8x32xf32>
    %186 = tpu.matmul %185, %7, %cst_70 {dimension_numbers = #tpu.dot_dimension_numbers<[1], [0], [0], [1], [0, 0, 1, 1], [], []>} : vector<8x32xbf16>, vector<32x32xbf16>, vector<8x32xf32> -> vector<8x32xf32>
    %187 = vector.broadcast %10 : vector<1x32xf32> to vector<8x32xf32>
    %188 = arith.addf %186, %187 : vector<8x32xf32>
    %cst_71 = arith.constant 1.000000e-01 : f32
    %189 = vector.broadcast %cst_71 : f32 to vector<8x32xf32>
    %190 = arith.mulf %189, %188 : vector<8x32xf32>
    %191 = arith.maximumf %188, %190 : vector<8x32xf32>
    %192 = arith.addf %162, %191 : vector<8x32xf32>
    %c6_i32 = arith.constant 6 : i32
    %c0_72 = arith.constant 0 : index
    %193 = arith.index_cast %c6_i32 : i32 to index
    %c0_73 = arith.constant 0 : index
    %194 = vector.load %arg4[%c0_72, %193, %c0_73] : memref<1x8x32xf32, #tpu.memory_space<vmem>>, vector<1x1x32xf32>
    %195 = vector.shape_cast %194 : vector<1x1x32xf32> to vector<1x32xf32>
    %196 = vector.broadcast %195 : vector<1x32xf32> to vector<8x32xf32>
    %197 = arith.addf %4, %196 : vector<8x32xf32>
    %cst_74 = arith.constant 1.000000e-01 : f32
    %198 = vector.broadcast %cst_74 : f32 to vector<8x32xf32>
    %199 = arith.mulf %198, %197 : vector<8x32xf32>
    %200 = arith.maximumf %197, %199 : vector<8x32xf32>
    %201 = arith.truncf %200 : vector<8x32xf32> to vector<8x32xbf16>
    %cst_75 = arith.constant dense<0.000000e+00> : vector<8x32xf32>
    %202 = tpu.matmul %201, %5, %cst_75 {dimension_numbers = #tpu.dot_dimension_numbers<[1], [0], [0], [1], [0, 0, 1, 1], [], []>} : vector<8x32xbf16>, vector<32x32xbf16>, vector<8x32xf32> -> vector<8x32xf32>
    %203 = vector.broadcast %8 : vector<1x32xf32> to vector<8x32xf32>
    %204 = arith.addf %202, %203 : vector<8x32xf32>
    %cst_76 = arith.constant 1.000000e-01 : f32
    %205 = vector.broadcast %cst_76 : f32 to vector<8x32xf32>
    %206 = arith.mulf %205, %204 : vector<8x32xf32>
    %207 = arith.maximumf %204, %206 : vector<8x32xf32>
    %208 = arith.truncf %207 : vector<8x32xf32> to vector<8x32xbf16>
    %cst_77 = arith.constant dense<0.000000e+00> : vector<8x32xf32>
    %209 = tpu.matmul %208, %6, %cst_77 {dimension_numbers = #tpu.dot_dimension_numbers<[1], [0], [0], [1], [0, 0, 1, 1], [], []>} : vector<8x32xbf16>, vector<32x32xbf16>, vector<8x32xf32> -> vector<8x32xf32>
    %210 = vector.broadcast %9 : vector<1x32xf32> to vector<8x32xf32>
    %211 = arith.addf %209, %210 : vector<8x32xf32>
    %cst_78 = arith.constant 1.000000e-01 : f32
    %212 = vector.broadcast %cst_78 : f32 to vector<8x32xf32>
    %213 = arith.mulf %212, %211 : vector<8x32xf32>
    %214 = arith.maximumf %211, %213 : vector<8x32xf32>
    %215 = arith.truncf %214 : vector<8x32xf32> to vector<8x32xbf16>
    %cst_79 = arith.constant dense<0.000000e+00> : vector<8x32xf32>
    %216 = tpu.matmul %215, %7, %cst_79 {dimension_numbers = #tpu.dot_dimension_numbers<[1], [0], [0], [1], [0, 0, 1, 1], [], []>} : vector<8x32xbf16>, vector<32x32xbf16>, vector<8x32xf32> -> vector<8x32xf32>
    %217 = vector.broadcast %10 : vector<1x32xf32> to vector<8x32xf32>
    %218 = arith.addf %216, %217 : vector<8x32xf32>
    %cst_80 = arith.constant 1.000000e-01 : f32
    %219 = vector.broadcast %cst_80 : f32 to vector<8x32xf32>
    %220 = arith.mulf %219, %218 : vector<8x32xf32>
    %221 = arith.maximumf %218, %220 : vector<8x32xf32>
    %222 = arith.addf %192, %221 : vector<8x32xf32>
    %c7_i32 = arith.constant 7 : i32
    %c0_81 = arith.constant 0 : index
    %223 = arith.index_cast %c7_i32 : i32 to index
    %c0_82 = arith.constant 0 : index
    %224 = vector.load %arg4[%c0_81, %223, %c0_82] : memref<1x8x32xf32, #tpu.memory_space<vmem>>, vector<1x1x32xf32>
    %225 = vector.shape_cast %224 : vector<1x1x32xf32> to vector<1x32xf32>
    %226 = vector.broadcast %225 : vector<1x32xf32> to vector<8x32xf32>
    %227 = arith.addf %4, %226 : vector<8x32xf32>
    %cst_83 = arith.constant 1.000000e-01 : f32
    %228 = vector.broadcast %cst_83 : f32 to vector<8x32xf32>
    %229 = arith.mulf %228, %227 : vector<8x32xf32>
    %230 = arith.maximumf %227, %229 : vector<8x32xf32>
    %231 = arith.truncf %230 : vector<8x32xf32> to vector<8x32xbf16>
    %cst_84 = arith.constant dense<0.000000e+00> : vector<8x32xf32>
    %232 = tpu.matmul %231, %5, %cst_84 {dimension_numbers = #tpu.dot_dimension_numbers<[1], [0], [0], [1], [0, 0, 1, 1], [], []>} : vector<8x32xbf16>, vector<32x32xbf16>, vector<8x32xf32> -> vector<8x32xf32>
    %233 = vector.broadcast %8 : vector<1x32xf32> to vector<8x32xf32>
    %234 = arith.addf %232, %233 : vector<8x32xf32>
    %cst_85 = arith.constant 1.000000e-01 : f32
    %235 = vector.broadcast %cst_85 : f32 to vector<8x32xf32>
    %236 = arith.mulf %235, %234 : vector<8x32xf32>
    %237 = arith.maximumf %234, %236 : vector<8x32xf32>
    %238 = arith.truncf %237 : vector<8x32xf32> to vector<8x32xbf16>
    %cst_86 = arith.constant dense<0.000000e+00> : vector<8x32xf32>
    %239 = tpu.matmul %238, %6, %cst_86 {dimension_numbers = #tpu.dot_dimension_numbers<[1], [0], [0], [1], [0, 0, 1, 1], [], []>} : vector<8x32xbf16>, vector<32x32xbf16>, vector<8x32xf32> -> vector<8x32xf32>
    %240 = vector.broadcast %9 : vector<1x32xf32> to vector<8x32xf32>
    %241 = arith.addf %239, %240 : vector<8x32xf32>
    %cst_87 = arith.constant 1.000000e-01 : f32
    %242 = vector.broadcast %cst_87 : f32 to vector<8x32xf32>
    %243 = arith.mulf %242, %241 : vector<8x32xf32>
    %244 = arith.maximumf %241, %243 : vector<8x32xf32>
    %245 = arith.truncf %244 : vector<8x32xf32> to vector<8x32xbf16>
    %cst_88 = arith.constant dense<0.000000e+00> : vector<8x32xf32>
    %246 = tpu.matmul %245, %7, %cst_88 {dimension_numbers = #tpu.dot_dimension_numbers<[1], [0], [0], [1], [0, 0, 1, 1], [], []>} : vector<8x32xbf16>, vector<32x32xbf16>, vector<8x32xf32> -> vector<8x32xf32>
    %247 = vector.broadcast %10 : vector<1x32xf32> to vector<8x32xf32>
    %248 = arith.addf %246, %247 : vector<8x32xf32>
    %cst_89 = arith.constant 1.000000e-01 : f32
    %249 = vector.broadcast %cst_89 : f32 to vector<8x32xf32>
    %250 = arith.mulf %249, %248 : vector<8x32xf32>
    %251 = arith.maximumf %248, %250 : vector<8x32xf32>
    %252 = arith.addf %222, %251 : vector<8x32xf32>
    %c8_i32 = arith.constant 8 : i32
    %253 = arith.addf %11, %252 : vector<8x32xf32>
    %c0_90 = arith.constant 0 : index
    %c0_91 = arith.constant 0 : index
    %254 = vector.load %arg16[%c0_90, %c0_91] : memref<8x32xf32, #tpu.memory_space<vmem>>, vector<8x32xf32>
    tpu.vector_store %arg16[%c0_90, %c0_91], %253 {strides = array<i32>} : memref<8x32xf32, #tpu.memory_space<vmem>>, vector<8x32xf32>,
    %c0_i32_92 = arith.constant 0 : i32
    %255 = arith.cmpi eq, %arg2, %c0_i32_92 : i32
    %256 = arith.extui %255 : i1 to i32
    %c0_i32_93 = arith.constant 0 : i32
    %257 = arith.cmpi ne, %256, %c0_i32_93 : i32
    scf.if %257 {
      %c0_94 = arith.constant 0 : index
      %c0_95 = arith.constant 0 : index
      %258 = vector.load %arg16[%c0_94, %c0_95] : memref<8x32xf32, #tpu.memory_space<vmem>>, vector<8x32xf32>
      %cst_96 = arith.constant 1.250000e-01 : f32
      %259 = vector.broadcast %cst_96 : f32 to vector<8x32xf32>
      %260 = arith.mulf %258, %259 : vector<8x32xf32>
      %261 = arith.truncf %260 : vector<8x32xf32> to vector<8x32xbf16>
      %c0_97 = arith.constant 0 : index
      %c0_98 = arith.constant 0 : index
      %262 = vector.load %arg11[%c0_97, %c0_98] : memref<32x32xbf16, #tpu.memory_space<vmem>>, vector<32x32xbf16>
      %cst_99 = arith.constant dense<0.000000e+00> : vector<8x32xf32>
      %263 = tpu.matmul %261, %262, %cst_99 {dimension_numbers = #tpu.dot_dimension_numbers<[1], [0], [0], [1], [0, 0, 1, 1], [], []>} : vector<8x32xbf16>, vector<32x32xbf16>, vector<8x32xf32> -> vector<8x32xf32>
      %c0_100 = arith.constant 0 : index
      %c0_101 = arith.constant 0 : index
      %264 = vector.load %arg12[%c0_100, %c0_101] : memref<1x32xf32, #tpu.memory_space<vmem>>, vector<1x32xf32>
      %265 = vector.broadcast %264 : vector<1x32xf32> to vector<8x32xf32>
      %266 = arith.addf %263, %265 : vector<8x32xf32>
      %cst_102 = arith.constant 1.000000e-01 : f32
      %267 = vector.broadcast %cst_102 : f32 to vector<8x32xf32>
      %268 = arith.mulf %267, %266 : vector<8x32xf32>
      %269 = arith.maximumf %266, %268 : vector<8x32xf32>
      %270 = arith.truncf %269 : vector<8x32xf32> to vector<8x32xbf16>
      %c0_103 = arith.constant 0 : index
      %c0_104 = arith.constant 0 : index
      %271 = vector.load %arg13[%c0_103, %c0_104] : memref<32x16xbf16, #tpu.memory_space<vmem>>, vector<32x16xbf16>
      %cst_105 = arith.constant dense<0.000000e+00> : vector<8x16xf32>
      %272 = tpu.matmul %270, %271, %cst_105 {dimension_numbers = #tpu.dot_dimension_numbers<[1], [0], [0], [1], [0, 0, 1, 1], [], []>} : vector<8x32xbf16>, vector<32x16xbf16>, vector<8x16xf32> -> vector<8x16xf32>
      %c0_106 = arith.constant 0 : index
      %c0_107 = arith.constant 0 : index
      %273 = vector.load %arg14[%c0_106, %c0_107] : memref<1x16xf32, #tpu.memory_space<vmem>>, vector<1x16xf32>
      %274 = vector.broadcast %273 : vector<1x16xf32> to vector<8x16xf32>
      %275 = arith.addf %272, %274 : vector<8x16xf32>
      %cst_108 = arith.constant 1.000000e-01 : f32
      %276 = vector.broadcast %cst_108 : f32 to vector<8x16xf32>
      %277 = arith.mulf %276, %275 : vector<8x16xf32>
      %278 = arith.maximumf %275, %277 : vector<8x16xf32>
      %c0_109 = arith.constant 0 : index
      %c0_110 = arith.constant 0 : index
      %c0_111 = arith.constant 0 : index
      %279 = vector.load %arg15[%c0_109, %c0_110, %c0_111] : memref<1x8x16xf32, #tpu.memory_space<vmem>>, vector<1x8x16xf32>
      %280 = vector.shape_cast %279 : vector<1x8x16xf32> to vector<8x16xf32>
      %281 = vector.shape_cast %278 : vector<8x16xf32> to vector<1x8x16xf32>
      tpu.vector_store %arg15[%c0_109, %c0_110, %c0_111], %281 {strides = array<i32>} : memref<1x8x16xf32, #tpu.memory_space<vmem>>, vector<1x8x16xf32>,
    } else {
    }
    return
  }
  func.func @transform_0(%arg0: i32, %arg1: i32, %arg2: i32) -> (i32, i32, i32) {
    %c0_i32 = arith.constant 0 : i32
    %c0_i32_0 = arith.constant 0 : i32
    return %arg0, %arg1, %c0_i32 : i32, i32, i32
  }
  func.func @transform_1(%arg0: i32, %arg1: i32, %arg2: i32) -> (i32, i32, i32) {
    %c0_i32 = arith.constant 0 : i32
    %c0_i32_0 = arith.constant 0 : i32
    return %arg0, %arg2, %c0_i32 : i32, i32, i32
  }
  func.func @transform_2(%arg0: i32, %arg1: i32, %arg2: i32) -> (i32, i32) {
    %c0_i32 = arith.constant 0 : i32
    %c0_i32_0 = arith.constant 0 : i32
    %c0_i32_1 = arith.constant 0 : i32
    return %c0_i32, %c0_i32_0 : i32, i32
  }
  func.func @transform_3(%arg0: i32, %arg1: i32, %arg2: i32) -> (i32, i32) {
    %c0_i32 = arith.constant 0 : i32
    %c0_i32_0 = arith.constant 0 : i32
    %c0_i32_1 = arith.constant 0 : i32
    return %c0_i32, %c0_i32_0 : i32, i32
  }
  func.func @transform_4(%arg0: i32, %arg1: i32, %arg2: i32) -> (i32, i32) {
    %c0_i32 = arith.constant 0 : i32
    %c0_i32_0 = arith.constant 0 : i32
    %c0_i32_1 = arith.constant 0 : i32
    return %c0_i32, %c0_i32_0 : i32, i32
  }
  func.func @transform_5(%arg0: i32, %arg1: i32, %arg2: i32) -> (i32, i32) {
    %c0_i32 = arith.constant 0 : i32
    %c0_i32_0 = arith.constant 0 : i32
    %c0_i32_1 = arith.constant 0 : i32
    return %c0_i32, %c0_i32_0 : i32, i32
  }
  func.func @transform_6(%arg0: i32, %arg1: i32, %arg2: i32) -> (i32, i32) {
    %c0_i32 = arith.constant 0 : i32
    %c0_i32_0 = arith.constant 0 : i32
    %c0_i32_1 = arith.constant 0 : i32
    return %c0_i32, %c0_i32_0 : i32, i32
  }
  func.func @transform_7(%arg0: i32, %arg1: i32, %arg2: i32) -> (i32, i32) {
    %c0_i32 = arith.constant 0 : i32
    %c0_i32_0 = arith.constant 0 : i32
    %c0_i32_1 = arith.constant 0 : i32
    return %c0_i32, %c0_i32_0 : i32, i32
  }
  func.func @transform_8(%arg0: i32, %arg1: i32, %arg2: i32) -> (i32, i32) {
    %c0_i32 = arith.constant 0 : i32
    %c0_i32_0 = arith.constant 0 : i32
    %c0_i32_1 = arith.constant 0 : i32
    return %c0_i32, %c0_i32_0 : i32, i32
  }
  func.func @transform_9(%arg0: i32, %arg1: i32, %arg2: i32) -> (i32, i32) {
    %c0_i32 = arith.constant 0 : i32
    %c0_i32_0 = arith.constant 0 : i32
    %c0_i32_1 = arith.constant 0 : i32
    return %c0_i32, %c0_i32_0 : i32, i32
  }
  func.func @transform_10(%arg0: i32, %arg1: i32, %arg2: i32) -> (i32, i32) {
    %c0_i32 = arith.constant 0 : i32
    %c0_i32_0 = arith.constant 0 : i32
    %c0_i32_1 = arith.constant 0 : i32
    return %c0_i32, %c0_i32_0 : i32, i32
  }
  func.func @transform_11(%arg0: i32, %arg1: i32, %arg2: i32) -> (i32, i32) {
    %c0_i32 = arith.constant 0 : i32
    %c0_i32_0 = arith.constant 0 : i32
    %c0_i32_1 = arith.constant 0 : i32
    return %c0_i32, %c0_i32_0 : i32, i32
  }
  func.func @transform_12(%arg0: i32, %arg1: i32, %arg2: i32) -> (i32, i32, i32) {
    %c0_i32 = arith.constant 0 : i32
    %c0_i32_0 = arith.constant 0 : i32
    return %arg0, %arg1, %c0_i32 : i32, i32, i32
  }
}

</mosaic_0001>

<bundles_post_ra>
// kernel: relation_layer2_forward.8
= control target key start
LH: loop header
LB: loop body
LE: loop exit
PB: predicated region body
PF: predicated region fallthrough
CT: control target
= control target key end

     0   :  { %vm31_vm0 = vcmask 1043456   ;;  %v259_v0 = vmov 0.0   ;;  %vm260_vm1 = vmmov 0   ;;  %vm27_vm2 = vcmask 64512   ;;  %s348_s1 = inlined_call_operand.vmem [shape: bf16[3,8,8], index: 1, kind: input, shape index: {}]   ;;  %s349_s0 = inlined_call_operand.vmem [shape: f32[2,10,8], index: 0, kind: input, shape index: {}]   ;;  %s350_s2 = inlined_call_operand.vmem [shape: f32[1,8], index: 2, kind: input, shape index: {}]   ;;  %s351_s3 = inlined_call_operand.vmem [shape: f32[2,8,8], index: 3, kind: output, shape index: {0}]   ;;  %s352_s4 = inlined_call_operand.vmem [shape: f32[1,1,8], index: 4, kind: output, shape index: {1}]   ;;  %s353_s5 = inlined_call_operand.vmem [shape: f32[1,1,8], index: 5, kind: output, shape index: {2}]  }
   0x1   :  { %239 = vmatprep.subr.bf16.mxu0 %v259_v0  ;;  %245 = vmatprep.subr.bf16.mxu1 %v259_v0  ;;  %v227_v1 = vld [vmem:[%s348_s1 + $0x4] sm:$0xf]  ;;  %v21_v2 = vld [vmem:[%s348_s1] sm:$0xf]  ;;  %v23_v6 = vld [vmem:[%s349_s0 + $0x11] sm:$0xff]  ;;  %vm201_vm3 = vcmask 57344  }
   0x2   :  { %v22_v3 = vld [vmem:[%s349_s0 + $0x1] sm:$0xff]  ;;  %v33_v4 = vsel %vm31_vm0, %v227_v1, 0  ;;  %v80_v5 = vsel %vm31_vm0, %v21_v2, 0  ;;  %241 = vmatprep.mubr.msk.bf16.mxu0 %vm260_vm1, %v259_v0  ;;  %247 = vmatprep.mubr.msk.bf16.mxu1 %vm260_vm1, %v259_v0  ;;  %v19_v8 = vld [vmem:[%s349_s0 + $0x10] sm:$0xff]  ;;  %v232_v27 = vld [vmem:[%s350_s2] ss:$0 sm:$0xff] }
   0x3   :  { %v18_v7 = vld [vmem:[%s349_s0] sm:$0xff]  ;;  %240 = vmatpush3.bf16.msra.mxu0 %v33_v4  ;;  %246 = vmatpush3.bf16.msra.mxu1 %v80_v5  ;;  %v24_v9 = vpack.c.bf16 %v23_v6, %v22_v3  ;;  %v230_v11 = vld [vmem:[%s348_s1 + $0x8] sm:$0xf]  ;;  %v124_v14 = vld [vmem:[%s349_s0 + $0x12] sm:$0xff] }
   0x4   :  { %v20_v10 = vpack.c.bf16 %v19_v8, %v18_v7  ;;  %251 = vmatprep.subr.bf16.mxu0 %v259_v0  ;;  %v132_v12 = vsel %vm31_vm0, %v230_v11, 0  ;;  %v123_v13 = vld [vmem:[%s349_s0 + $0x2] sm:$0xff] }
   0x5   :  { %v125_v15 = vpack.c.bf16 %v124_v14, %v123_v13 }
   0x6   :  { %242 = vmatmul.mubr.msk.bf16.vlgmr.msra.gmra.mrb[0].mxu0 %vm27_vm2, %v24_v9  ;;  %248 = vmatmul.mubr.msk.bf16.vlgmr.msra.gmra.mrb[0].mxu1 %vm27_vm2, %v20_v10 }
   0x7   :  { %252 = vmatpush3.bf16.msra.mxu0 %v132_v12  ;;  %253 = vmatprep.mubr.msk.bf16.mxu0 %vm260_vm1, %v259_v0 }
   0xe   :  { %254 = vmatmul.mubr.msk.bf16.vlgmr.msra.gmra.mrb[4].mxu0 %vm27_vm2, %v125_v15 }
  0xd9   :  { %v69_v16 = vpop.f32.mrb[0].mxu0  ;;  %v116_v17 = vpop.f32.mrb[0].mxu1 }
  0xda   :  { %v117_v18 = vadd.f32 %v116_v17, %v69_v16  ;;  %v243_v19 = vpop.f32.mrb[1].mxu0  ;;  %v249_v20 = vpop.f32.mrb[1].mxu1 }
  0xdb   :  { %v72_v21 = vpop.f32.mrb[2].mxu0  ;;  %v119_v22 = vpop.f32.mrb[2].mxu1 }
  0xdc   :  { %v120_v23 = vadd.f32 %v119_v22, %v72_v21  ;;  %v244_v24 = vpop.f32.mrb[3].mxu0  ;;  %v250_v25 = vpop.f32.mrb[3].mxu1 }
  0xe1   :  { %v168_v26 = vpop.f32.mrb[4].mxu0 }
  0xe2   :  { %v175_v28 = vadd.f32 %v168_v26, %v117_v18  ;;  %v255_v29 = vpop.f32.mrb[5].mxu0 }
  0xe3   :  { %v171_v30 = vpop.f32.mrb[6].mxu0 }
  0xe4   :  { %v184_v31 = vadd.f32 %v232_v27, %v175_v28  ;;  %v176_v32 = vadd.f32 %v171_v30, %v120_v23  ;;  %v256_v33 = vpop.f32.mrb[7].mxu0 }
  0xe6   :  { %v186_v34 = vmul.f32 0.1, %v184_v31  ;;  %v185_v35 = vadd.f32 %v232_v27, %v176_v32 }
  0xe8   :  { %v188_v36 = vmax.f32 %v184_v31, %v186_v34  ;;  %v187_v37 = vmul.f32 0.1, %v185_v35 }
  0xea   :  { %190 = vst.msk [vmem:[%s351_s3] sm:$0xff] %vm27_vm2, %v188_v36  ;;  %v203_v38 = vmul.f32 %v188_v36, %v188_v36  ;;  %v189_v39 = vmax.f32 %v185_v35, %v187_v37  ;;  %v192_v40 = vsel %vm27_vm2, %v188_v36, 0.0 }
  0xec   :  { %191 = vst.msk [vmem:[%s351_s3 + $0x8] sm:$0xff] %vm27_vm2, %v189_v39  ;;  %v193_v41 = vsel %vm27_vm2, %v189_v39, 0.0  ;;  %v204_v42 = vmul.f32 %v189_v39, %v189_v39  ;;  %v205_v44 = vsel %vm27_vm2, %v203_v38, 0.0 }
  0xed   :  { %v194_v43 = vadd.f32 %v193_v41, %v192_v40 }
  0xee   :  { %v206_v45 = vsel %vm27_vm2, %v204_v42, 0.0 }
  0xef   :  { %v195_v46 = vrot.slane %v194_v43, 4  ;;  %v207_v47 = vadd.f32 %v206_v45, %v205_v44 }
  0xf1   :  { %v196_v48 = vadd.f32 %v195_v46, %v194_v43  ;;  %v208_v49 = vrot.slane %v207_v47, 4 }
  0xf3   :  { %v197_v50 = vrot.slane %v196_v48, 2  ;;  %v209_v51 = vadd.f32 %v208_v49, %v207_v47 }
  0xf5   :  { %v198_v52 = vadd.f32 %v197_v50, %v196_v48  ;;  %v210_v53 = vrot.slane %v209_v51, 2 }
  0xf7   :  { %v199_v54 = vrot.slane %v198_v52, 1  ;;  %v211_v55 = vadd.f32 %v210_v53, %v209_v51 }
  0xf9   :  { %v200_v56 = vadd.f32 %v199_v54, %v198_v52  ;;  %v212_v57 = vrot.slane %v211_v55, 1 }
  0xfb   :  { %202 = vst.msk [vmem:[%s352_s4] sm:$0x1] %vm201_vm3, %v200_v56  ;;  %v213_v58 = vadd.f32 %v212_v57, %v211_v55 }
  0xfd   :  { %214 = vst.msk [vmem:[%s353_s5] sm:$0x1] %vm201_vm3, %v213_v58 }

// kernel: relation_layer2_forward.9
= control target key start
LH: loop header
LB: loop body
LE: loop exit
PB: predicated region body
PF: predicated region fallthrough
CT: control target
= control target key end

     0   :  { %vm54_vm0 = vcmask 64512   ;;  %vm56_vm1 = vcmask 58368   ;;  %v69_v0 = vmov 0.0   ;;  %v39_v9 = vlaneseq  ;;  %s140_s5 = inlined_call_operand.vmem [shape: f32[2,10,8], index: 5, kind: output, shape index: {}]   ;;  %s141_s1 = inlined_call_operand.vmem [shape: f32[1,1,8], index: 1, kind: input, shape index: {}]   ;;  %s142_s2 = inlined_call_operand.vmem [shape: f32[1,1,8], index: 2, kind: input, shape index: {}]   ;;  %s143_s3 = inlined_call_operand.vmem [shape: f32[1,8], index: 3, kind: input, shape index: {}]   ;;  %s144_s0 = inlined_call_operand.vmem [shape: f32[2,8,8], index: 0, kind: input, shape index: {}]   ;;  %s145_s4 = inlined_call_operand.vmem [shape: f32[1,8], index: 4, kind: input, shape index: {}]  }
   0x1   :  { %55 = vst.msk [vmem:[%s140_s5] sm:$0xff] %vm54_vm0, %v69_v0  ;;  %58 = vst.msk [vmem:[%s140_s5 + $0x10] sm:$0xff] %vm54_vm0, %v69_v0  ;;  %v20_v1 = vld [vmem:[%s141_s1] sm:$0x1]  ;;  %v37_v17 = vld [vmem:[%s144_s0 + $0x8] sm:$0xff] }
   0x2   :  { %57 = vst.msk [vmem:[%s140_s5 + $0x8] sm:$0x3] %vm56_vm1, %v69_v0  ;;  %59 = vst.msk [vmem:[%s140_s5 + $0x18] sm:$0x3] %vm56_vm1, %v69_v0  ;;  %v22_v2 = vld [vmem:[%s142_s2] sm:$0x1] }
   0x3   :  { %v24_v3 = vmul.f32 0.0625, %v20_v1  ;;  %v25_v4 = vmul.f32 0.0625, %v22_v2  ;;  %v40_v10 = vshrl.u32 %v39_v9, 7  ;;  %v29_v11 = vld [vmem:[%s143_s3] sm:$0x1] }
   0x4   :  { %v33_v15 = vld [vmem:[%s145_s4] sm:$0x1] }
   0x5   :  { %v26_v5 = vmul.f32 %v24_v3, %v24_v3  ;;  %v41_v12 = vsub.s32 0, %v40_v10  ;;  %v36_v16 = vld [vmem:[%s144_s0] sm:$0xff] }
   0x7   :  { %v27_v6 = vsub.f32 %v25_v4, %v26_v5 }
   0x9   :  { %v28_v7 = vmax.f32 %v27_v6, 0.0 }
   0xb   :  { %v30_v8 = vadd.f32 1e-05, %v28_v7 }
   0xd   :  { %67 = vrsqrt.f32 %v30_v8 }
  0x17   :  { %v68_v13 = vpop.eup %67 }
  0x18   :  { %v32_v14 = vmul.f32 %v68_v13, %v29_v11 }
  0x1a   :  { %v34_v18 = vmul.f32 %v32_v14, %v24_v3  ;;  %v42_v19 = vrot.slane %v32_v14, %v41_v12 }
  0x1c   :  { %v35_v20 = vsub.f32 %v33_v15, %v34_v18  ;;  %v44_v21 = vmul.f32 %v42_v19, %v36_v16  ;;  %v45_v22 = vmul.f32 %v42_v19, %v37_v17 }
  0x1e   :  { %v50_v23 = vrot.slane %v35_v20, %v41_v12 }
  0x20   :  { %v52_v24 = vadd.f32 %v50_v23, %v44_v21  ;;  %v53_v25 = vadd.f32 %v50_v23, %v45_v22 }
  0x22   :  { %60 = vst.msk [vmem:[%s140_s5 + $0x1] sm:$0xff] %vm54_vm0, %v52_v24  ;;  %61 = vst.msk [vmem:[%s140_s5 + $0x11] sm:$0xff] %vm54_vm0, %v53_v25 }

// kernel: relation_layer2_forward.11
= control target key start
LH: loop header
LB: loop body
LE: loop exit
PB: predicated region body
PF: predicated region fallthrough
CT: control target
= control target key end

     0   :  { %vm31_vm0 = vcmask 1043456   ;;  %v387_v0 = vmov 0.0   ;;  %vm388_vm1 = vmmov 0   ;;  %vm27_vm2 = vcmask 64512   ;;  %s500_s1 = inlined_call_operand.vmem [shape: bf16[5,8,8], index: 1, kind: input, shape index: {}]   ;;  %s501_s0 = inlined_call_operand.vmem [shape: f32[2,12,8], index: 0, kind: input, shape index: {}]   ;;  %s502_s2 = inlined_call_operand.vmem [shape: f32[1,8], index: 2, kind: input, shape index: {}]   ;;  %s503_s3 = inlined_call_operand.vmem [shape: f32[2,8,8], index: 3, kind: output, shape index: {0}]   ;;  %s504_s4 = inlined_call_operand.vmem [shape: f32[1,1,8], index: 4, kind: output, shape index: {1}]   ;;  %s505_s5 = inlined_call_operand.vmem [shape: f32[1,1,8], index: 5, kind: output, shape index: {2}]  }
   0x1   :  { %355 = vmatprep.subr.bf16.mxu0 %v387_v0  ;;  %361 = vmatprep.subr.bf16.mxu1 %v387_v0  ;;  %v335_v1 = vld [vmem:[%s500_s1 + $0x4] sm:$0xf]  ;;  %v21_v2 = vld [vmem:[%s500_s1] sm:$0xf]  ;;  %v23_v6 = vld [vmem:[%s501_s0 + $0x11] sm:$0xff]  ;;  %vm309_vm3 = vcmask 57344  }
   0x2   :  { %v22_v3 = vld [vmem:[%s501_s0 + $0x1] sm:$0xff]  ;;  %v33_v4 = vsel %vm31_vm0, %v335_v1, 0  ;;  %v80_v5 = vsel %vm31_vm0, %v21_v2, 0  ;;  %357 = vmatprep.mubr.msk.bf16.mxu0 %vm388_vm1, %v387_v0  ;;  %363 = vmatprep.mubr.msk.bf16.mxu1 %vm388_vm1, %v387_v0  ;;  %v19_v8 = vld [vmem:[%s501_s0 + $0x10] sm:$0xff]  ;;  %v340_v12 = vld [vmem:[%s500_s1 + $0xc] sm:$0xf] }
   0x3   :  { %v18_v7 = vld [vmem:[%s501_s0] sm:$0xff]  ;;  %356 = vmatpush3.bf16.msra.mxu0 %v33_v4  ;;  %362 = vmatpush3.bf16.msra.mxu1 %v80_v5  ;;  %v24_v9 = vpack.c.bf16 %v23_v6, %v22_v3  ;;  %v338_v11 = vld [vmem:[%s500_s1 + $0x8] sm:$0xf]  ;;  %v186_v14 = vsel %vm31_vm0, %v340_v12, 0  ;;  %v124_v16 = vld [vmem:[%s501_s0 + $0x12] sm:$0xff] }
   0x4   :  { %v20_v10 = vpack.c.bf16 %v19_v8, %v18_v7  ;;  %367 = vmatprep.subr.bf16.mxu0 %v387_v0  ;;  %v132_v13 = vsel %vm31_vm0, %v338_v11, 0  ;;  %373 = vmatprep.subr.bf16.mxu1 %v387_v0  ;;  %v123_v15 = vld [vmem:[%s501_s0 + $0x2] sm:$0xff]  ;;  %v178_v18 = vld [vmem:[%s501_s0 + $0x13] sm:$0xff]  ;;  %v344_v49 = vld [vmem:[%s502_s2] ss:$0 sm:$0xff] }
   0x5   :  { %v177_v17 = vld [vmem:[%s501_s0 + $0x3] sm:$0xff]  ;;  %v342_v19 = vld [vmem:[%s500_s1 + $0x10] sm:$0xf]  ;;  %v125_v20 = vpack.c.bf16 %v124_v16, %v123_v15  ;;  %v232_v24 = vld [vmem:[%s501_s0 + $0x14] sm:$0xff] }
   0x6   :  { %358 = vmatmul.mubr.msk.bf16.vlgmr.msra.gmra.mrb[0].mxu0 %vm27_vm2, %v24_v9  ;;  %364 = vmatmul.mubr.msk.bf16.vlgmr.msra.gmra.mrb[0].mxu1 %vm27_vm2, %v20_v10  ;;  %v179_v21 = vpack.c.bf16 %v178_v18, %v177_v17  ;;  %v240_v22 = vsel %vm31_vm0, %v342_v19, 0  ;;  %v231_v23 = vld [vmem:[%s501_s0 + $0x4] sm:$0xff] }
   0x7   :  { %368 = vmatpush3.bf16.msra.mxu0 %v132_v13  ;;  %369 = vmatprep.mubr.msk.bf16.mxu0 %vm388_vm1, %v387_v0  ;;  %v233_v25 = vpack.c.bf16 %v232_v24, %v231_v23 }
   0x8   :  { %374 = vmatpush3.bf16.msra.mxu1 %v186_v14  ;;  %379 = vmatprep.subr.bf16.mxu0 %v387_v0 }
   0x9   :  { %375 = vmatprep.mubr.msk.bf16.mxu1 %vm388_vm1, %v387_v0 }
   0xe   :  { %370 = vmatmul.mubr.msk.bf16.vlgmr.msra.gmra.mrb[4].mxu0 %vm27_vm2, %v125_v20  ;;  %376 = vmatmul.mubr.msk.bf16.vlgmr.msra.gmra.mrb[4].mxu1 %vm27_vm2, %v179_v21 }
   0xf   :  { %380 = vmatpush3.bf16.msra.mxu0 %v240_v22  ;;  %381 = vmatprep.mubr.msk.bf16.mxu0 %vm388_vm1, %v387_v0 }
  0x16   :  { %382 = vmatmul.mubr.msk.bf16.vlgmr.msra.gmra.mrb[8].mxu0 %vm27_vm2, %v233_v25 }
  0xd9   :  { %v69_v26 = vpop.f32.mrb[0].mxu0  ;;  %v116_v27 = vpop.f32.mrb[0].mxu1 }
  0xda   :  { %v117_v28 = vadd.f32 %v116_v27, %v69_v26  ;;  %v359_v29 = vpop.f32.mrb[1].mxu0  ;;  %v365_v30 = vpop.f32.mrb[1].mxu1 }
  0xdb   :  { %v72_v31 = vpop.f32.mrb[2].mxu0  ;;  %v119_v32 = vpop.f32.mrb[2].mxu1 }
  0xdc   :  { %v120_v33 = vadd.f32 %v119_v32, %v72_v31  ;;  %v360_v34 = vpop.f32.mrb[3].mxu0  ;;  %v366_v35 = vpop.f32.mrb[3].mxu1 }
  0xe1   :  { %v168_v36 = vpop.f32.mrb[4].mxu0  ;;  %v222_v37 = vpop.f32.mrb[4].mxu1 }
  0xe2   :  { %v175_v38 = vadd.f32 %v168_v36, %v117_v28  ;;  %v371_v39 = vpop.f32.mrb[5].mxu0  ;;  %v377_v40 = vpop.f32.mrb[5].mxu1 }
  0xe3   :  { %v171_v41 = vpop.f32.mrb[6].mxu0  ;;  %v225_v42 = vpop.f32.mrb[6].mxu1 }
  0xe4   :  { %v176_v43 = vadd.f32 %v171_v41, %v120_v33  ;;  %v229_v44 = vadd.f32 %v222_v37, %v175_v38  ;;  %v372_v45 = vpop.f32.mrb[7].mxu0  ;;  %v378_v46 = vpop.f32.mrb[7].mxu1 }
  0xe6   :  { %v230_v47 = vadd.f32 %v225_v42, %v176_v43 }
  0xe9   :  { %v276_v48 = vpop.f32.mrb[8].mxu0 }
  0xea   :  { %v283_v50 = vadd.f32 %v276_v48, %v229_v44  ;;  %v383_v51 = vpop.f32.mrb[9].mxu0 }
  0xeb   :  { %v279_v52 = vpop.f32.mrb[10].mxu0 }
  0xec   :  { %v292_v53 = vadd.f32 %v344_v49, %v283_v50  ;;  %v284_v54 = vadd.f32 %v279_v52, %v230_v47  ;;  %v384_v55 = vpop.f32.mrb[11].mxu0 }
  0xee   :  { %v294_v56 = vmul.f32 0.1, %v292_v53  ;;  %v293_v57 = vadd.f32 %v344_v49, %v284_v54 }
  0xf0   :  { %v296_v58 = vmax.f32 %v292_v53, %v294_v56  ;;  %v295_v59 = vmul.f32 0.1, %v293_v57 }
  0xf2   :  { %298 = vst.msk [vmem:[%s503_s3] sm:$0xff] %vm27_vm2, %v296_v58  ;;  %v311_v60 = vmul.f32 %v296_v58, %v296_v58  ;;  %v297_v61 = vmax.f32 %v293_v57, %v295_v59  ;;  %v300_v62 = vsel %vm27_vm2, %v296_v58, 0.0 }
  0xf4   :  { %299 = vst.msk [vmem:[%s503_s3 + $0x8] sm:$0xff] %vm27_vm2, %v297_v61  ;;  %v301_v63 = vsel %vm27_vm2, %v297_v61, 0.0  ;;  %v312_v0 = vmul.f32 %v297_v61, %v297_v61  ;;  %v313_v2 = vsel %vm27_vm2, %v311_v60, 0.0 }
  0xf5   :  { %v302_v1 = vadd.f32 %v301_v63, %v300_v62 }
  0xf6   :  { %v314_v3 = vsel %vm27_vm2, %v312_v0, 0.0 }
  0xf7   :  { %v303_v4 = vrot.slane %v302_v1, 4  ;;  %v315_v5 = vadd.f32 %v314_v3, %v313_v2 }
  0xf9   :  { %v304_v6 = vadd.f32 %v303_v4, %v302_v1  ;;  %v316_v7 = vrot.slane %v315_v5, 4 }
  0xfb   :  { %v305_v8 = vrot.slane %v304_v6, 2  ;;  %v317_v9 = vadd.f32 %v316_v7, %v315_v5 }
  0xfd   :  { %v306_v10 = vadd.f32 %v305_v8, %v304_v6  ;;  %v318_v11 = vrot.slane %v317_v9, 2 }
  0xff   :  { %v307_v12 = vrot.slane %v306_v10, 1  ;;  %v319_v13 = vadd.f32 %v318_v11, %v317_v9 }
 0x101   :  { %v308_v14 = vadd.f32 %v307_v12, %v306_v10  ;;  %v320_v15 = vrot.slane %v319_v13, 1 }
 0x103   :  { %310 = vst.msk [vmem:[%s504_s4] sm:$0x1] %vm309_vm3, %v308_v14  ;;  %v321_v16 = vadd.f32 %v320_v15, %v319_v13 }
 0x105   :  { %322 = vst.msk [vmem:[%s505_s5] sm:$0x1] %vm309_vm3, %v321_v16 }

// kernel: relation_layer2_forward.12
= control target key start
LH: loop header
LB: loop body
LE: loop exit
PB: predicated region body
PF: predicated region fallthrough
CT: control target
= control target key end

     0   :  { %vm54_vm0 = vcmask 64512   ;;  %vm56_vm1 = vcmask 60416   ;;  %v69_v0 = vmov 0.0   ;;  %v39_v9 = vlaneseq  ;;  %s140_s5 = inlined_call_operand.vmem [shape: f32[2,12,8], index: 5, kind: output, shape index: {}]   ;;  %s141_s1 = inlined_call_operand.vmem [shape: f32[1,1,8], index: 1, kind: input, shape index: {}]   ;;  %s142_s2 = inlined_call_operand.vmem [shape: f32[1,1,8], index: 2, kind: input, shape index: {}]   ;;  %s143_s3 = inlined_call_operand.vmem [shape: f32[1,8], index: 3, kind: input, shape index: {}]   ;;  %s144_s0 = inlined_call_operand.vmem [shape: f32[2,8,8], index: 0, kind: input, shape index: {}]   ;;  %s145_s4 = inlined_call_operand.vmem [shape: f32[1,8], index: 4, kind: input, shape index: {}]  }
   0x1   :  { %55 = vst.msk [vmem:[%s140_s5] sm:$0xff] %vm54_vm0, %v69_v0  ;;  %58 = vst.msk [vmem:[%s140_s5 + $0x10] sm:$0xff] %vm54_vm0, %v69_v0  ;;  %v20_v1 = vld [vmem:[%s141_s1] sm:$0x1]  ;;  %v37_v17 = vld [vmem:[%s144_s0 + $0x8] sm:$0xff] }
   0x2   :  { %57 = vst.msk [vmem:[%s140_s5 + $0x8] sm:$0xf] %vm56_vm1, %v69_v0  ;;  %59 = vst.msk [vmem:[%s140_s5 + $0x18] sm:$0xf] %vm56_vm1, %v69_v0  ;;  %v22_v2 = vld [vmem:[%s142_s2] sm:$0x1] }
   0x3   :  { %v24_v3 = vmul.f32 0.0625, %v20_v1  ;;  %v25_v4 = vmul.f32 0.0625, %v22_v2  ;;  %v40_v10 = vshrl.u32 %v39_v9, 7  ;;  %v29_v11 = vld [vmem:[%s143_s3] sm:$0x1] }
   0x4   :  { %v33_v15 = vld [vmem:[%s145_s4] sm:$0x1] }
   0x5   :  { %v26_v5 = vmul.f32 %v24_v3, %v24_v3  ;;  %v41_v12 = vsub.s32 0, %v40_v10  ;;  %v36_v16 = vld [vmem:[%s144_s0] sm:$0xff] }
   0x7   :  { %v27_v6 = vsub.f32 %v25_v4, %v26_v5 }
   0x9   :  { %v28_v7 = vmax.f32 %v27_v6, 0.0 }
   0xb   :  { %v30_v8 = vadd.f32 1e-05, %v28_v7 }
   0xd   :  { %67 = vrsqrt.f32 %v30_v8 }
  0x17   :  { %v68_v13 = vpop.eup %67 }
  0x18   :  { %v32_v14 = vmul.f32 %v68_v13, %v29_v11 }
  0x1a   :  { %v34_v18 = vmul.f32 %v32_v14, %v24_v3  ;;  %v42_v19 = vrot.slane %v32_v14, %v41_v12 }
  0x1c   :  { %v35_v20 = vsub.f32 %v33_v15, %v34_v18  ;;  %v44_v21 = vmul.f32 %v42_v19, %v36_v16  ;;  %v45_v22 = vmul.f32 %v42_v19, %v37_v17 }
  0x1e   :  { %v50_v23 = vrot.slane %v35_v20, %v41_v12 }
  0x20   :  { %v52_v24 = vadd.f32 %v50_v23, %v44_v21  ;;  %v53_v25 = vadd.f32 %v50_v23, %v45_v22 }
  0x22   :  { %60 = vst.msk [vmem:[%s140_s5 + $0x2] sm:$0xff] %vm54_vm0, %v52_v24  ;;  %61 = vst.msk [vmem:[%s140_s5 + $0x12] sm:$0xff] %vm54_vm0, %v53_v25 }

// kernel: relation_layer2_forward.14
= control target key start
LH: loop header
LB: loop body
LE: loop exit
PB: predicated region body
PF: predicated region fallthrough
CT: control target
= control target key end

     0   :  { %v196_v0 = vmov 0.0   ;;  %vm197_vm0 = vmmov 0   ;;  %vm62_vm1 = vcmask 130048   ;;  %vm107_vm2 = vcmask 261120   ;;  %s275_s3 = inlined_call_operand.vmem [shape: bf16[16,32], index: 3, kind: input, shape index: {}]   ;;  %s276_s4 = inlined_call_operand.vmem [shape: bf16[16,32], index: 4, kind: input, shape index: {}]   ;;  %s277_s0 = inlined_call_operand.vmem [shape: f32[16,16], index: 0, kind: input, shape index: {}]   ;;  %s278_s1 = inlined_call_operand.vmem [shape: f32[1,16], index: 1, kind: input, shape index: {}]   ;;  %s279_s2 = inlined_call_operand.vmem [shape: f32[1,16], index: 2, kind: input, shape index: {}]   ;;  %s280_s5 = inlined_call_operand.vmem [shape: f32[1,32], index: 5, kind: input, shape index: {}]   ;;  %s281_s7 = inlined_call_operand.vmem [shape: f32[16,32], index: 7, kind: output, shape index: {1}]   ;;  %s282_s6 = inlined_call_operand.vmem [shape: f32[16,32], index: 6, kind: output, shape index: {0}]  }
   0x1   :  { %180 = vmatprep.subr.bf16.mxu0 %v196_v0  ;;  %186 = vmatprep.subr.bf16.mxu1 %v196_v0  ;;  %v194_v1 = vld [vmem:[%s275_s3] sm:$0xff]   ;;  %v27_v4 = vld [vmem:[%s277_s0 + $0x8] sm:$0xff] }
   0x2   :  { %v195_v2 = vld [vmem:[%s276_s4] sm:$0xff]   ;;  %182 = vmatprep.mubr.msk.bf16.mxu0 %vm197_vm0, %v196_v0  ;;  %188 = vmatprep.mubr.msk.bf16.mxu1 %vm197_vm0, %v196_v0 }
   0x3   :  { %181 = vmatpush3.bf16.msra.mxu0 %v194_v1  ;;  %v26_v3 = vld [vmem:[%s277_s0] sm:$0xff]  ;;  %187 = vmatpush3.bf16.msra.mxu1 %v195_v2 }
   0x4   :  { %v169_v5 = vld [vmem:[%s278_s1] ss:$0 sm:$0xff] }
   0x5   :  { %v35_v6 = vmul.f32 %v169_v5, %v26_v3  ;;  %v36_v7 = vmul.f32 %v169_v5, %v27_v4  ;;  %v170_v8 = vld [vmem:[%s279_s2] ss:$0 sm:$0xff] }
   0x6   :  { %v171_v12 = vld [vmem:[%s280_s5] ss:$0 sm:$0xff] }
   0x7   :  { %v44_v9 = vadd.f32 %v170_v8, %v35_v6  ;;  %v45_v10 = vadd.f32 %v170_v8, %v36_v7 }
   0x9   :  { %v46_v11 = vpack.c.bf16 %v45_v10, %v44_v9 }
   0xb   :  { %183 = vmatmul.mubr.msk.bf16.vlgmr.msra.gmra.mrb[0].mxu0 %vm62_vm1, %v46_v11  ;;  %189 = vmatmul.mubr.msk.bf16.vlgmr.msra.gmra.mrb[0].mxu1 %vm62_vm1, %v46_v11 }
  0xde   :  { %v100_v13 = vpop.f32.mrb[0].mxu0  ;;  %v152_v14 = vpop.f32.mrb[0].mxu1 }
  0xdf   :  { %v101_v15 = vadd.f32 %v171_v12, %v100_v13  ;;  %159 = vst.msk [vmem:[%s281_s7] sm:$0xff] %vm107_vm2, %v152_v14  ;;  %v184_v16 = vpop.f32.mrb[1].mxu0  ;;  %v190_v17 = vpop.f32.mrb[1].mxu1 }
  0xe0   :  { %v103_v18 = vpop.f32.mrb[2].mxu0  ;;  %v155_v19 = vpop.f32.mrb[2].mxu1 }
  0xe1   :  { %108 = vst.msk [vmem:[%s282_s6] sm:$0xff] %vm107_vm2, %v101_v15  ;;  %v104_v20 = vadd.f32 %v171_v12, %v103_v18  ;;  %160 = vst.msk [vmem:[%s281_s7 + $0x8] sm:$0xff] %vm107_vm2, %v155_v19  ;;  %v185_v21 = vpop.f32.mrb[3].mxu0  ;;  %v191_v22 = vpop.f32.mrb[3].mxu1 }
  0xe3   :  { %109 = vst.msk [vmem:[%s282_s6 + $0x8] sm:$0xff] %vm107_vm2, %v104_v20 }

// kernel: relation_layer2_forward.15
= control target key start
LH: loop header
LB: loop body
LE: loop exit
PB: predicated region body
PF: predicated region fallthrough
CT: control target
= control target key end

     0   :  { %s2441_s21 = smov 0   ;;  %s2443_s22 = smov 0   ;;  %s2770_s0 = inlined_call_operand.vmem [shape: f32[2,8,32], index: 0, kind: input, shape index: {}]   ;;  %s2771_s1 = inlined_call_operand.vmem [shape: f32[2,8,32], index: 1, kind: input, shape index: {}]   ;;  %s2772_s2 = inlined_call_operand.vmem [shape: bf16[32,32], index: 2, kind: input, shape index: {}]   ;;  %s2773_s3 = inlined_call_operand.vmem [shape: f32[1,32], index: 3, kind: input, shape index: {}]   ;;  %s2774_s4 = inlined_call_operand.vmem [shape: bf16[32,32], index: 4, kind: input, shape index: {}]   ;;  %s2775_s5 = inlined_call_operand.vmem [shape: f32[1,32], index: 5, kind: input, shape index: {}]   ;;  %s2776_s6 = inlined_call_operand.vmem [shape: bf16[32,32], index: 6, kind: input, shape index: {}]   ;;  %s2777_s7 = inlined_call_operand.vmem [shape: f32[1,32], index: 7, kind: input, shape index: {}]   ;;  %s2778_s8 = inlined_call_operand.vmem [shape: bf16[32,32], index: 8, kind: input, shape index: {}]   ;;  %s2779_s9 = inlined_call_operand.vmem [shape: f32[1,32], index: 9, kind: input, shape index: {}]   ;;  %s2780_s10 = inlined_call_operand.vmem [shape: bf16[32,16], index: 10, kind: input, shape index: {}]   ;;  %s2781_s11 = inlined_call_operand.vmem [shape: f32[1,16], index: 11, kind: input, shape index: {}]   ;;  %s2782_s12 = inlined_call_operand.vmem [shape: f32[2,8,16], index: 12, kind: output, shape index: {}]  }
   0x1   :  { %s2445_s23 = smov 0  }
   0x2 LB: > { %s41_s24 = sadd.s32 1, %s2368_s22  ;;  %p1973_p0 = scmp.ge.s32.totalorder %s2372_s23, 1  ;;  %s2372_s23 = sphi %s2445_s23, %s22_s23   ;;  %s2368_s22 = sphi %s2443_s22, %s2784_s22   ;;  %s2364_s21 = sphi %s2441_s21, %s2783_s21  }
   0x3   : > { %p43_p1 = scmp.ge.s32.totalorder %s41_s24, 2  ;;  %p401_p2 = scmp.lt.s32.totalorder %s2372_s23, 3 }
   0x5   : > { %s2786_s24 = smov (%p43_p1, %s41_s24), 0  ;;  %p402_p3 = pnand %p1973_p0, %p401_p2 }
   0x6   : > { %v2462_v0 = vld [vmem:[%s2772_s2] sm:$0xff] (!%p402_p3)   ;;  %v2374_v1 = vmov (!%p402_p3), 0.0   ;;  %v2470_v2 = vld [vmem:[%s2772_s2 + $0x8] sm:$0xff] (!%p402_p3)   ;;  %vm2375_vm0 = vmmov (!%p402_p3), 0   ;;  %p454_p4 = scmp.lt.s32.totalorder (!%p402_p3), %s2364_s21, 1  ;;  %vm480_vm1 = vcmask (!%p402_p3), 261120  }
   0x7   : > { %405 = sbr.rel (%p402_p3) target bundleno = 2736 (0xab0), region = 68  ;;  %2106 = vmatprep.subr.bf16.mxu0 (!%p402_p3), %v2374_v1  ;;  %2114 = vmatprep.subr.bf16.mxu1 (!%p402_p3), %v2374_v1  ;;  %481 = vst.msk [vmem:[#allocation2] sm:$0xff] (!%p402_p3), %vm480_vm1, %v2374_v1  ;;  %v2503_v9 = vld [vmem:[%s2774_s4] sm:$0xff] (!%p402_p3)   ;;  %v2510_v10 = vld [vmem:[%s2774_s4 + $0x8] sm:$0xff] (!%p402_p3)   ;;  %vm1875_vm2 = vcmask (!%p402_p3), 130048  }
   0x8   : > { %2107 = vmatpush3.bf16.msra.mxu0 (!%p402_p3), %v2462_v0  ;;  %2110 = vmatprep.mubr.msk.bf16.mxu0 (!%p402_p3), %vm2375_vm0, %v2374_v1  ;;  %v2517_v11 = vld [vmem:[%s2773_s3] ss:$0 sm:$0xff] (!%p402_p3)  ;;  %v2544_v26 = vld [vmem:[%s2776_s6 + $0x8] sm:$0xff] (!%p402_p3)  }
   0x9   : > { %2108 = vmatprep.subr.bf16.mxu0 (!%p402_p3), %v2374_v1  ;;  %2118 = vmatprep.mubr.msk.bf16.mxu1 (!%p402_p3), %vm2375_vm0, %v2374_v1  ;;  %v2535_v25 = vld [vmem:[%s2776_s6] sm:$0xff] (!%p402_p3)  }
   0xa   : > { %2115 = vmatpush3.bf16.msra.mxu1 (!%p402_p3), %v2503_v9  ;;  %v2553_v27 = vld [vmem:[%s2775_s5] ss:$0 sm:$0xff] (!%p402_p3) }
   0xb   : > { %2116 = vmatprep.subr.bf16.mxu1 (!%p402_p3), %v2374_v1 }
   0xc   : > { %2109 = vmatpush3.bf16.msra.mxu0 (!%p402_p3), %v2470_v2 }
   0xd   : > { %2122 = vmatprep.subr.bf16.mxu0 (!%p402_p3), %v2374_v1 }
   0xe   : > { %s2788_s21 = smov (!%p454_p4, %s2364_s21), 1  ;;  %2117 = vmatpush3.bf16.msra.mxu1 %v2510_v10 }
   0xf   : > { %s2480_s29 = sshll.u32 %s2788_s21, 3  ;;  %2130 = vmatprep.subr.bf16.mxu1 %v2374_v1 }
  0x10   : > { %s460_s14 = scalar_lea.vmem %s2770_s0, %s2480_s29  ;;  %s2490_s17 = scalar_lea.vmem %s2771_s1, %s2480_s29 }
  0x11   : > { %v2493_v3 = vld [vmem:[%s460_s14] sm:$0xff] }
  0x12   : > { %v1977_v4 = vld [vmem:[%s2490_s17] ss:$0 sm:$0xff]  ;;  %v1990_v12 = vld [vmem:[%s2490_s17 + $0x1] ss:$0 sm:$0xff]  ;;  %v1994_v35 = vld [vmem:[%s2490_s17 + $0x2] ss:$0 sm:$0xff] }
  0x13   : > { %v504_v5 = vadd.f32 %v1977_v4, %v2493_v3  ;;  %v706_v16 = vadd.f32 %v1990_v12, %v2493_v3  ;;  %v853_v40 = vadd.f32 %v1994_v35, %v2493_v3  ;;  %v1998_v60 = vld [vmem:[%s2490_s17 + $0x3] ss:$0 sm:$0xff] }
  0x15   : > { %v505_v6 = vmul.f32 0.1, %v504_v5  ;;  %v707_v21 = vmul.f32 0.1, %v706_v16  ;;  %v854_v45 = vmul.f32 0.1, %v853_v40 }
  0x17   : > { %v506_v7 = vmax.f32 %v504_v5, %v505_v6  ;;  %v708_v23 = vmax.f32 %v706_v16, %v707_v21  ;;  %v855_v47 = vmax.f32 %v853_v40, %v854_v45  ;;  %v1000_v5 = vadd.f32 %v1998_v60, %v2493_v3 }
  0x19   : > { %v507_v8 = vpack.c.bf16 %v506_v7, %v506_v7  ;;  %v709_v24 = vpack.c.bf16 %v708_v23, %v708_v23  ;;  %v856_v48 = vpack.c.bf16 %v855_v47, %v855_v47 }
  0x1b   : > { %2111 = vmatmul.mubr.msk.bf16.vlgmr.msra.gmra.mrb[0].mxu0 %vm480_vm1, %v507_v8 }
  0x1c   : > { %2126 = vmatprep.mubr.msk.bf16.mxu0 %vm2375_vm0, %v2374_v1  ;;  %2123 = vmatpush3.bf16.msra.mxu0 %v2535_v25 }
  0x1d   : > { %2124 = vmatprep.subr.bf16.mxu0 %v2374_v1 }
  0x20   : > { %2125 = vmatpush3.bf16.msra.mxu0 %v2544_v26 }
  0x21   : > { %2138 = vmatprep.subr.bf16.mxu0 %v2374_v1 }
  0xee   : > { %v564_v13 = vpop.f32.mrb[0].mxu0 }
  0xef   : > { %v565_v14 = vadd.f32 %v2517_v11, %v564_v13  ;;  %v2112_v15 = vpop.f32.mrb[1].mxu0  ;;  %v1001_v13 = vmul.f32 0.1, %v1000_v5 }
  0xf0   : > { %v567_v17 = vpop.f32.mrb[2].mxu0 }
  0xf1   : > { %v570_v18 = vmul.f32 0.1, %v565_v14  ;;  %v2113_v19 = vpop.f32.mrb[3].mxu0  ;;  %v1002_v15 = vmax.f32 %v1000_v5, %v1001_v13  ;;  %v2608_v17 = vld [vmem:[%s2777_s7] ss:$0 sm:$0xff] }
  0xf3   : > { %v571_v20 = vmax.f32 %v565_v14, %v570_v18  ;;  %v1003_v16 = vpack.c.bf16 %v1002_v15, %v1002_v15 }
  0xf5   : > { %v572_v22 = vpack.c.bf16 %v571_v20, %v571_v20 }
  0xf7   : > { %2119 = vmatmul.mubr.msk.bf16.vlgmr.msra.gmra.mrb[0].mxu1 %vm480_vm1, %v572_v22 }
  0xf8   : > { %2131 = vmatpush3.bf16.msra.mxu1 %v2462_v0  ;;  %2134 = vmatprep.mubr.msk.bf16.mxu1 %vm2375_vm0, %v2374_v1 }
  0xf9   : > { %2132 = vmatprep.subr.bf16.mxu1 %v2374_v1 }
  0xfc   : > { %2133 = vmatpush3.bf16.msra.mxu1 %v2470_v2 }
  0xfd   : > { %2146 = vmatprep.subr.bf16.mxu1 %v2374_v1 }
  0xff   : > { %2135 = vmatmul.mubr.msk.bf16.vlgmr.msra.gmra.mrb[4].mxu1 %vm480_vm1, %v709_v24 }
 0x100   : > { %2150 = vmatprep.mubr.msk.bf16.mxu1 %vm2375_vm0, %v2374_v1  ;;  %2147 = vmatpush3.bf16.msra.mxu1 %v2535_v25 }
 0x101   : > { %2148 = vmatprep.subr.bf16.mxu1 %v2374_v1 }
 0x104   : > { %2149 = vmatpush3.bf16.msra.mxu1 %v2544_v26 }
 0x105   : > { %2162 = vmatprep.subr.bf16.mxu1 %v2374_v1 }
 0x1ca   : > { %v628_v28 = vpop.f32.mrb[0].mxu1 }
 0x1cb   : > { %v629_v29 = vadd.f32 %v2553_v27, %v628_v28  ;;  %v2120_v30 = vpop.f32.mrb[1].mxu1 }
 0x1cc   : > { %v631_v31 = vpop.f32.mrb[2].mxu1 }
 0x1cd   : > { %v634_v32 = vmul.f32 0.1, %v629_v29  ;;  %v2121_v33 = vpop.f32.mrb[3].mxu1 }
 0x1cf   : > { %v635_v34 = vmax.f32 %v629_v29, %v634_v32 }
 0x1d1   : > { %v636_v36 = vpack.c.bf16 %v635_v34, %v635_v34 }
 0x1d2   : > { %v747_v37 = vpop.f32.mrb[4].mxu1 }
 0x1d3   : > { %v748_v38 = vadd.f32 %v2517_v11, %v747_v37  ;;  %2127 = vmatmul.mubr.msk.bf16.vlgmr.msra.gmra.mrb[4].mxu0 %vm480_vm1, %v636_v36  ;;  %v2136_v39 = vpop.f32.mrb[5].mxu1 }
 0x1d4   : > { %2139 = vmatpush3.bf16.msra.mxu0 %v2503_v9  ;;  %v750_v41 = vpop.f32.mrb[6].mxu1  ;;  %2142 = vmatprep.mubr.msk.bf16.mxu0 %vm2375_vm0, %v2374_v1  ;;  %v2002_v39 = vld [vmem:[%s2490_s17 + $0x4] ss:$0 sm:$0xff] }
 0x1d5   : > { %v753_v42 = vmul.f32 0.1, %v748_v38  ;;  %v2137_v43 = vpop.f32.mrb[7].mxu1  ;;  %2140 = vmatprep.subr.bf16.mxu0 %v2374_v1 }
 0x1d7   : > { %v754_v44 = vmax.f32 %v748_v38, %v753_v42 }
 0x1d8   : > { %2141 = vmatpush3.bf16.msra.mxu0 %v2510_v10 }
 0x1d9   : > { %v755_v46 = vpack.c.bf16 %v754_v44, %v754_v44  ;;  %2154 = vmatprep.subr.bf16.mxu0 %v2374_v1  ;;  %v1147_v44 = vadd.f32 %v2002_v39, %v2493_v3 }
 0x1db   : > { %2143 = vmatmul.mubr.msk.bf16.vlgmr.msra.gmra.mrb[8].mxu0 %vm480_vm1, %v755_v46 }
 0x1dc   : > { %2155 = vmatpush3.bf16.msra.mxu0 %v2462_v0  ;;  %2158 = vmatprep.mubr.msk.bf16.mxu0 %vm2375_vm0, %v2374_v1 }
 0x1dd   : > { %2156 = vmatprep.subr.bf16.mxu0 %v2374_v1 }
 0x1e0   : > { %2157 = vmatpush3.bf16.msra.mxu0 %v2470_v2 }
 0x1e1   : > { %2170 = vmatprep.subr.bf16.mxu0 %v2374_v1 }
 0x1e3   : > { %2159 = vmatmul.mubr.msk.bf16.vlgmr.msra.gmra.mrb[12].mxu0 %vm480_vm1, %v856_v48 }
 0x1e4   : > { %2171 = vmatpush3.bf16.msra.mxu0 %v2535_v25  ;;  %2174 = vmatprep.mubr.msk.bf16.mxu0 %vm2375_vm0, %v2374_v1 }
 0x1e5   : > { %2172 = vmatprep.subr.bf16.mxu0 %v2374_v1 }
 0x1e8   : > { %2173 = vmatpush3.bf16.msra.mxu0 %v2544_v26 }
 0x1e9   : > { %2186 = vmatprep.subr.bf16.mxu0 %v2374_v1 }
 0x2a6   : > { %v692_v49 = vpop.f32.mrb[4].mxu0 }
 0x2a7   : > { %v2128_v50 = vpop.f32.mrb[5].mxu0  ;;  %v693_v18 = vadd.f32 %v2608_v17, %v692_v49  ;;  %v1148_v49 = vmul.f32 0.1, %v1147_v44 }
 0x2a8   : > { %v695_v51 = vpop.f32.mrb[6].mxu0 }
 0x2a9   : > { %v2129_v52 = vpop.f32.mrb[7].mxu0  ;;  %v698_v20 = vmul.f32 0.1, %v693_v18  ;;  %v1149_v51 = vmax.f32 %v1147_v44, %v1148_v49  ;;  %v2010_v44 = vld [vmem:[%s2490_s17 + $0x6] ss:$0 sm:$0xff] }
 0x2aa   : > { %v1441_v49 = vadd.f32 %v2010_v44, %v2493_v3 }
 0x2ab   : > { %v699_v29 = vmax.f32 %v693_v18, %v698_v20  ;;  %v1150_v52 = vpack.c.bf16 %v1149_v51, %v1149_v51 }
 0x2ae   : > { %v793_v53 = vpop.f32.mrb[8].mxu0 }
 0x2af   : > { %v794_v54 = vadd.f32 %v2553_v27, %v793_v53  ;;  %v2144_v55 = vpop.f32.mrb[9].mxu0 }
 0x2b0   : > { %v796_v56 = vpop.f32.mrb[10].mxu0 }
 0x2b1   : > { %v799_v57 = vmul.f32 0.1, %v794_v54  ;;  %v2145_v58 = vpop.f32.mrb[11].mxu0 }
 0x2b3   : > { %v800_v59 = vmax.f32 %v794_v54, %v799_v57 }
 0x2b5   : > { %v801_v61 = vpack.c.bf16 %v800_v59, %v800_v59 }
 0x2b6   : > { %v894_v62 = vpop.f32.mrb[12].mxu0 }
 0x2b7   : > { %v895_v63 = vadd.f32 %v2517_v11, %v894_v62  ;;  %2151 = vmatmul.mubr.msk.bf16.vlgmr.msra.gmra.mrb[8].mxu1 %vm480_vm1, %v801_v61  ;;  %v2160_v4 = vpop.f32.mrb[13].mxu0 }
 0x2b8   : > { %2163 = vmatpush3.bf16.msra.mxu1 %v2503_v9  ;;  %v897_v6 = vpop.f32.mrb[14].mxu0  ;;  %2166 = vmatprep.mubr.msk.bf16.mxu1 %vm2375_vm0, %v2374_v1 }
 0x2b9   : > { %v900_v7 = vmul.f32 0.1, %v895_v63  ;;  %v2161_v8 = vpop.f32.mrb[15].mxu0  ;;  %2164 = vmatprep.subr.bf16.mxu1 %v2374_v1 }
 0x2ba   : > { %v2006_v8 = vld [vmem:[%s2490_s17 + $0x5] ss:$0 sm:$0xff] }
 0x2bb   : > { %v901_v12 = vmax.f32 %v895_v63, %v900_v7 }
 0x2bc   : > { %2165 = vmatpush3.bf16.msra.mxu1 %v2510_v10 }
 0x2bd   : > { %v902_v14 = vpack.c.bf16 %v901_v12, %v901_v12  ;;  %2178 = vmatprep.subr.bf16.mxu1 %v2374_v1 }
 0x2bf   : > { %2167 = vmatmul.mubr.msk.bf16.vlgmr.msra.gmra.mrb[12].mxu1 %vm480_vm1, %v902_v14 }
 0x2c0   : > { %2179 = vmatpush3.bf16.msra.mxu1 %v2462_v0  ;;  %2182 = vmatprep.mubr.msk.bf16.mxu1 %vm2375_vm0, %v2374_v1 }
 0x2c1   : > { %2180 = vmatprep.subr.bf16.mxu1 %v2374_v1 }
 0x2c4   : > { %2181 = vmatpush3.bf16.msra.mxu1 %v2470_v2 }
 0x2c5   : > { %2194 = vmatprep.subr.bf16.mxu1 %v2374_v1 }
 0x2c7   : > { %2183 = vmatmul.mubr.msk.bf16.vlgmr.msra.gmra.mrb[16].mxu1 %vm480_vm1, %v1003_v16  ;;  %v1294_v16 = vadd.f32 %v2006_v8, %v2493_v3 }
 0x2c8   : > { %2195 = vmatpush3.bf16.msra.mxu1 %v2535_v25  ;;  %2198 = vmatprep.mubr.msk.bf16.mxu1 %vm2375_vm0, %v2374_v1 }
 0x2c9   : > { %2196 = vmatprep.subr.bf16.mxu1 %v2374_v1 }
 0x2cc   : > { %2197 = vmatpush3.bf16.msra.mxu1 %v2544_v26 }
 0x2cd   : > { %2210 = vmatprep.subr.bf16.mxu1 %v2374_v1 }
 0x38a   : > { %v839_v19 = vpop.f32.mrb[8].mxu1 }
 0x38b   : > { %v840_v21 = vadd.f32 %v2608_v17, %v839_v19  ;;  %v2152_v22 = vpop.f32.mrb[9].mxu1 }
 0x38c   : > { %v842_v23 = vpop.f32.mrb[10].mxu1  ;;  %v1295_v22 = vmul.f32 0.1, %v1294_v16 }
 0x38d   : > { %v845_v24 = vmul.f32 0.1, %v840_v21  ;;  %v2153_v28 = vpop.f32.mrb[11].mxu1 }
 0x38f   : > { %v846_v30 = vmax.f32 %v840_v21, %v845_v24  ;;  %v1296_v24 = vmax.f32 %v1294_v16, %v1295_v22  ;;  %v2014_v16 = vld [vmem:[%s2490_s17 + $0x7] ss:$0 sm:$0xff]  ;;  %s474_s17 = scalar_lea.vmem %s2782_s12, %s2480_s29 }
 0x390   : > { %v1588_v22 = vadd.f32 %v2014_v16, %v2493_v3 }
 0x391   : > { %v847_v31 = vadd.f32 %v846_v30, %v699_v29  ;;  %v1297_v28 = vpack.c.bf16 %v1296_v24, %v1296_v24 }
 0x392   : > { %v940_v32 = vpop.f32.mrb[12].mxu1 }
 0x393   : > { %v941_v33 = vadd.f32 %v2553_v27, %v940_v32  ;;  %v2168_v34 = vpop.f32.mrb[13].mxu1 }
 0x394   : > { %v943_v35 = vpop.f32.mrb[14].mxu1 }
 0x395   : > { %v946_v36 = vmul.f32 0.1, %v941_v33  ;;  %v2169_v37 = vpop.f32.mrb[15].mxu1 }
 0x397   : > { %v947_v38 = vmax.f32 %v941_v33, %v946_v36 }
 0x399   : > { %v948_v40 = vpack.c.bf16 %v947_v38, %v947_v38 }
 0x39a   : > { %v1041_v41 = vpop.f32.mrb[16].mxu1 }
 0x39b   : > { %v1042_v42 = vadd.f32 %v2517_v11, %v1041_v41  ;;  %2175 = vmatmul.mubr.msk.bf16.vlgmr.msra.gmra.mrb[16].mxu0 %vm480_vm1, %v948_v40  ;;  %v2184_v43 = vpop.f32.mrb[17].mxu1 }
 0x39c   : > { %2187 = vmatpush3.bf16.msra.mxu0 %v2503_v9  ;;  %v1044_v45 = vpop.f32.mrb[18].mxu1  ;;  %2190 = vmatprep.mubr.msk.bf16.mxu0 %vm2375_vm0, %v2374_v1 }
 0x39d   : > { %v1047_v46 = vmul.f32 0.1, %v1042_v42  ;;  %v2185_v47 = vpop.f32.mrb[19].mxu1  ;;  %2188 = vmatprep.subr.bf16.mxu0 %v2374_v1 }
 0x39f   : > { %v1048_v48 = vmax.f32 %v1042_v42, %v1047_v46 }
 0x3a0   : > { %2189 = vmatpush3.bf16.msra.mxu0 %v2510_v10 }
 0x3a1   : > { %v1049_v50 = vpack.c.bf16 %v1048_v48, %v1048_v48  ;;  %2202 = vmatprep.subr.bf16.mxu0 %v2374_v1 }
 0x3a3   : > { %2191 = vmatmul.mubr.msk.bf16.vlgmr.msra.gmra.mrb[20].mxu0 %vm480_vm1, %v1049_v50 }
 0x3a4   : > { %2203 = vmatpush3.bf16.msra.mxu0 %v2462_v0  ;;  %2206 = vmatprep.mubr.msk.bf16.mxu0 %vm2375_vm0, %v2374_v1 }
 0x3a5   : > { %2204 = vmatprep.subr.bf16.mxu0 %v2374_v1 }
 0x3a8   : > { %2205 = vmatpush3.bf16.msra.mxu0 %v2470_v2 }
 0x3a9   : > { %2218 = vmatprep.subr.bf16.mxu0 %v2374_v1 }
 0x3ab   : > { %2207 = vmatmul.mubr.msk.bf16.vlgmr.msra.gmra.mrb[24].mxu0 %vm480_vm1, %v1150_v52 }
 0x3ac   : > { %2219 = vmatpush3.bf16.msra.mxu0 %v2535_v25  ;;  %2222 = vmatprep.mubr.msk.bf16.mxu0 %vm2375_vm0, %v2374_v1 }
 0x3ad   : > { %2220 = vmatprep.subr.bf16.mxu0 %v2374_v1 }
 0x3b0   : > { %2221 = vmatpush3.bf16.msra.mxu0 %v2544_v26 }
 0x3b1   : > { %2234 = vmatprep.subr.bf16.mxu0 %v2374_v1 }
 0x46e   : > { %v986_v53 = vpop.f32.mrb[16].mxu0 }
 0x46f   : > { %v987_v54 = vadd.f32 %v2608_v17, %v986_v53  ;;  %v2176_v55 = vpop.f32.mrb[17].mxu0 }
 0x470   : > { %v989_v56 = vpop.f32.mrb[18].mxu0 }
 0x471   : > { %v992_v57 = vmul.f32 0.1, %v987_v54  ;;  %v2177_v58 = vpop.f32.mrb[19].mxu0 }
 0x473   : > { %v993_v59 = vmax.f32 %v987_v54, %v992_v57  ;;  %v1442_v54 = vmul.f32 0.1, %v1441_v49 }
 0x475   : > { %v994_v60 = vadd.f32 %v993_v59, %v847_v31  ;;  %v1443_v56 = vmax.f32 %v1441_v49, %v1442_v54 }
 0x476   : > { %v1087_v61 = vpop.f32.mrb[20].mxu0 }
 0x477   : > { %v1088_v62 = vadd.f32 %v2553_v27, %v1087_v61  ;;  %v2192_v63 = vpop.f32.mrb[21].mxu0  ;;  %v1444_v57 = vpack.c.bf16 %v1443_v56, %v1443_v56 }
 0x478   : > { %v1090_v4 = vpop.f32.mrb[22].mxu0 }
 0x479   : > { %v1093_v5 = vmul.f32 0.1, %v1088_v62  ;;  %v2193_v6 = vpop.f32.mrb[23].mxu0 }
 0x47b   : > { %v1094_v7 = vmax.f32 %v1088_v62, %v1093_v5 }
 0x47d   : > { %v1095_v12 = vpack.c.bf16 %v1094_v7, %v1094_v7 }
 0x47e   : > { %v1188_v13 = vpop.f32.mrb[24].mxu0 }
 0x47f   : > { %v1189_v14 = vadd.f32 %v2517_v11, %v1188_v13  ;;  %2199 = vmatmul.mubr.msk.bf16.vlgmr.msra.gmra.mrb[20].mxu1 %vm480_vm1, %v1095_v12  ;;  %v2208_v15 = vpop.f32.mrb[25].mxu0 }
 0x480   : > { %2211 = vmatpush3.bf16.msra.mxu1 %v2503_v9  ;;  %v1191_v18 = vpop.f32.mrb[26].mxu0  ;;  %2214 = vmatprep.mubr.msk.bf16.mxu1 %vm2375_vm0, %v2374_v1 }
 0x481   : > { %v1194_v19 = vmul.f32 0.1, %v1189_v14  ;;  %v2209_v20 = vpop.f32.mrb[27].mxu0  ;;  %2212 = vmatprep.subr.bf16.mxu1 %v2374_v1 }
 0x483   : > { %v1195_v21 = vmax.f32 %v1189_v14, %v1194_v19 }
 0x484   : > { %2213 = vmatpush3.bf16.msra.mxu1 %v2510_v10 }
 0x485   : > { %v1196_v23 = vpack.c.bf16 %v1195_v21, %v1195_v21  ;;  %2226 = vmatprep.subr.bf16.mxu1 %v2374_v1 }
 0x487   : > { %2215 = vmatmul.mubr.msk.bf16.vlgmr.msra.gmra.mrb[24].mxu1 %vm480_vm1, %v1196_v23 }
 0x488   : > { %2227 = vmatpush3.bf16.msra.mxu1 %v2462_v0  ;;  %2230 = vmatprep.mubr.msk.bf16.mxu1 %vm2375_vm0, %v2374_v1 }
 0x489   : > { %2228 = vmatprep.subr.bf16.mxu1 %v2374_v1 }
 0x48c   : > { %2229 = vmatpush3.bf16.msra.mxu1 %v2470_v2 }
 0x48d   : > { %2242 = vmatprep.subr.bf16.mxu1 %v2374_v1 }
 0x48f   : > { %2231 = vmatmul.mubr.msk.bf16.vlgmr.msra.gmra.mrb[28].mxu1 %vm480_vm1, %v1297_v28 }
 0x490   : > { %2243 = vmatpush3.bf16.msra.mxu1 %v2535_v25  ;;  %2246 = vmatprep.mubr.msk.bf16.mxu1 %vm2375_vm0, %v2374_v1 }
 0x491   : > { %2244 = vmatprep.subr.bf16.mxu1 %v2374_v1 }
 0x494   : > { %2245 = vmatpush3.bf16.msra.mxu1 %v2544_v26 }
 0x495   : > { %2258 = vmatprep.subr.bf16.mxu1 %v2374_v1 }
 0x552   : > { %v1133_v29 = vpop.f32.mrb[20].mxu1 }
 0x553   : > { %v1134_v30 = vadd.f32 %v2608_v17, %v1133_v29  ;;  %v2200_v31 = vpop.f32.mrb[21].mxu1 }
 0x554   : > { %v1136_v32 = vpop.f32.mrb[22].mxu1 }
 0x555   : > { %v1139_v33 = vmul.f32 0.1, %v1134_v30  ;;  %v2201_v34 = vpop.f32.mrb[23].mxu1 }
 0x557   : > { %v1140_v35 = vmax.f32 %v1134_v30, %v1139_v33  ;;  %v1589_v30 = vmul.f32 0.1, %v1588_v22 }
 0x559   : > { %v1141_v36 = vadd.f32 %v1140_v35, %v994_v60  ;;  %v1590_v3 = vmax.f32 %v1588_v22, %v1589_v30 }
 0x55a   : > { %v1234_v37 = vpop.f32.mrb[24].mxu1 }
 0x55b   : > { %v1235_v38 = vadd.f32 %v2553_v27, %v1234_v37  ;;  %v2216_v39 = vpop.f32.mrb[25].mxu1  ;;  %v1591_v32 = vpack.c.bf16 %v1590_v3, %v1590_v3 }
 0x55c   : > { %v1237_v40 = vpop.f32.mrb[26].mxu1 }
 0x55d   : > { %v1240_v41 = vmul.f32 0.1, %v1235_v38  ;;  %v2217_v42 = vpop.f32.mrb[27].mxu1 }
 0x55f   : > { %v1241_v43 = vmax.f32 %v1235_v38, %v1240_v41 }
 0x561   : > { %v1242_v45 = vpack.c.bf16 %v1241_v43, %v1241_v43 }
 0x562   : > { %v1335_v46 = vpop.f32.mrb[28].mxu1 }
 0x563   : > { %v1336_v47 = vadd.f32 %v2517_v11, %v1335_v46  ;;  %2223 = vmatmul.mubr.msk.bf16.vlgmr.msra.gmra.mrb[28].mxu0 %vm480_vm1, %v1242_v45  ;;  %v2232_v48 = vpop.f32.mrb[29].mxu1 }
 0x564   : > { %2235 = vmatpush3.bf16.msra.mxu0 %v2503_v9  ;;  %v1338_v50 = vpop.f32.mrb[30].mxu1  ;;  %2238 = vmatprep.mubr.msk.bf16.mxu0 %vm2375_vm0, %v2374_v1 }
 0x565   : > { %v1341_v51 = vmul.f32 0.1, %v1336_v47  ;;  %v2233_v52 = vpop.f32.mrb[31].mxu1  ;;  %2236 = vmatprep.subr.bf16.mxu0 %v2374_v1 }
 0x567   : > { %v1342_v53 = vmax.f32 %v1336_v47, %v1341_v51 }
 0x568   : > { %2237 = vmatpush3.bf16.msra.mxu0 %v2510_v10 }
 0x569   : > { %v1343_v55 = vpack.c.bf16 %v1342_v53, %v1342_v53  ;;  %2250 = vmatprep.subr.bf16.mxu0 %v2374_v1 }
 0x56b   : > { %2239 = vmatmul.mubr.msk.bf16.vlgmr.msra.gmra.mrb[32].mxu0 %vm480_vm1, %v1343_v55 }
 0x56c   : > { %2251 = vmatpush3.bf16.msra.mxu0 %v2462_v0  ;;  %2254 = vmatprep.mubr.msk.bf16.mxu0 %vm2375_vm0, %v2374_v1 }
 0x56d   : > { %2252 = vmatprep.subr.bf16.mxu0 %v2374_v1 }
 0x570   : > { %2253 = vmatpush3.bf16.msra.mxu0 %v2470_v2 }
 0x571   : > { %2266 = vmatprep.subr.bf16.mxu0 %v2374_v1 }
 0x573   : > { %2255 = vmatmul.mubr.msk.bf16.vlgmr.msra.gmra.mrb[36].mxu0 %vm480_vm1, %v1444_v57 }
 0x574   : > { %2267 = vmatpush3.bf16.msra.mxu0 %v2535_v25  ;;  %2270 = vmatprep.mubr.msk.bf16.mxu0 %vm2375_vm0, %v2374_v1 }
 0x575   : > { %2268 = vmatprep.subr.bf16.mxu0 %v2374_v1 }
 0x578   : > { %2269 = vmatpush3.bf16.msra.mxu0 %v2544_v26 }
 0x579   : > { %2282 = vmatprep.subr.bf16.mxu0 %v2374_v1 }
 0x636   : > { %v1280_v58 = vpop.f32.mrb[28].mxu0 }
 0x637   : > { %v1281_v59 = vadd.f32 %v2608_v17, %v1280_v58  ;;  %v2224_v60 = vpop.f32.mrb[29].mxu0 }
 0x638   : > { %v1283_v61 = vpop.f32.mrb[30].mxu0 }
 0x639   : > { %v1286_v62 = vmul.f32 0.1, %v1281_v59  ;;  %v2225_v63 = vpop.f32.mrb[31].mxu0 }
 0x63b   : > { %v1287_v4 = vmax.f32 %v1281_v59, %v1286_v62 }
 0x63d   : > { %v1288_v5 = vadd.f32 %v1287_v4, %v1141_v36 }
 0x63e   : > { %v1381_v6 = vpop.f32.mrb[32].mxu0 }
 0x63f   : > { %v1382_v7 = vadd.f32 %v2553_v27, %v1381_v6  ;;  %v2240_v8 = vpop.f32.mrb[33].mxu0  ;;  %v2346_v6 = vld [vmem:[%s2778_s8] sm:$0xff]  }
 0x640   : > { %v1384_v12 = vpop.f32.mrb[34].mxu0 }
 0x641   : > { %v1387_v13 = vmul.f32 0.1, %v1382_v7  ;;  %v2241_v14 = vpop.f32.mrb[35].mxu0 }
 0x643   : > { %v1388_v15 = vmax.f32 %v1382_v7, %v1387_v13 }
 0x645   : > { %v1389_v18 = vpack.c.bf16 %v1388_v15, %v1388_v15 }
 0x646   : > { %v1482_v19 = vpop.f32.mrb[36].mxu0 }
 0x647   : > { %v1483_v20 = vadd.f32 %v2517_v11, %v1482_v19  ;;  %2247 = vmatmul.mubr.msk.bf16.vlgmr.msra.gmra.mrb[32].mxu1 %vm480_vm1, %v1389_v18  ;;  %v2256_v21 = vpop.f32.mrb[37].mxu0  ;;  %v498_v18 = vld [vmem:[#allocation2] sm:$0xff] }
 0x648   : > { %2259 = vmatpush3.bf16.msra.mxu1 %v2503_v9  ;;  %v1485_v23 = vpop.f32.mrb[38].mxu0  ;;  %2262 = vmatprep.mubr.msk.bf16.mxu1 %vm2375_vm0, %v2374_v1 }
 0x649   : > { %v1488_v24 = vmul.f32 0.1, %v1483_v20  ;;  %v2257_v28 = vpop.f32.mrb[39].mxu0  ;;  %2260 = vmatprep.subr.bf16.mxu1 %v2374_v1 }
 0x64a   : > { %v2018_v28 = vld [vmem:[%s2779_s9] ss:$0 sm:$0xff] }
 0x64b   : > { %v1489_v29 = vmax.f32 %v1483_v20, %v1488_v24  ;;  %v2348_v24 = vld [vmem:[%s2780_s10] sm:$0xff]  }
 0x64c   : > { %2261 = vmatpush3.bf16.msra.mxu1 %v2510_v10 }
 0x64d   : > { %v1490_v31 = vpack.c.bf16 %v1489_v29, %v1489_v29  ;;  %2274 = vmatprep.subr.bf16.mxu1 %v2374_v1 }
 0x64f   : > { %2263 = vmatmul.mubr.msk.bf16.vlgmr.msra.gmra.mrb[36].mxu1 %vm480_vm1, %v1490_v31 }
 0x650   : > { %2275 = vmatpush3.bf16.msra.mxu1 %v2462_v0  ;;  %2278 = vmatprep.mubr.msk.bf16.mxu1 %vm2375_vm0, %v2374_v1 }
 0x651   : > { %2276 = vmatprep.subr.bf16.mxu1 %v2374_v1 }
 0x654   : > { %2277 = vmatpush3.bf16.msra.mxu1 %v2470_v2 }
 0x655   : > { %2290 = vmatprep.subr.bf16.mxu1 %v2374_v1 }
 0x657   : > { %2279 = vmatmul.mubr.msk.bf16.vlgmr.msra.gmra.mrb[40].mxu1 %vm480_vm1, %v1591_v32 }
 0x658   : > { %2291 = vmatpush3.bf16.msra.mxu1 %v2535_v25  ;;  %2294 = vmatprep.mubr.msk.bf16.mxu1 %vm2375_vm0, %v2374_v1 }
 0x659   : > { %2292 = vmatprep.subr.bf16.mxu1 %v2374_v1 }
 0x65c   : > { %2293 = vmatpush3.bf16.msra.mxu1 %v2544_v26 }
 0x65d   : > { %2306 = vmatprep.subr.bf16.mxu1 %v2374_v1 }
 0x71a   : > { %v1427_v0 = vpop.f32.mrb[32].mxu1 }
 0x71b   : > { %v1428_v33 = vadd.f32 %v2608_v17, %v1427_v0  ;;  %v2248_v34 = vpop.f32.mrb[33].mxu1 }
 0x71c   : > { %v1430_v2 = vpop.f32.mrb[34].mxu1 }
 0x71d   : > { %v1433_v35 = vmul.f32 0.1, %v1428_v33  ;;  %v2249_v36 = vpop.f32.mrb[35].mxu1 }
 0x71f   : > { %v1434_v37 = vmax.f32 %v1428_v33, %v1433_v35 }
 0x721   : > { %v1435_v38 = vadd.f32 %v1434_v37, %v1288_v5 }
 0x722   : > { %v1528_v39 = vpop.f32.mrb[36].mxu1 }
 0x723   : > { %v1529_v25 = vadd.f32 %v2553_v27, %v1528_v39  ;;  %v2264_v40 = vpop.f32.mrb[37].mxu1 }
 0x724   : > { %v1531_v41 = vpop.f32.mrb[38].mxu1 }
 0x725   : > { %v1534_v42 = vmul.f32 0.1, %v1529_v25  ;;  %v2265_v43 = vpop.f32.mrb[39].mxu1 }
 0x727   : > { %v1535_v44 = vmax.f32 %v1529_v25, %v1534_v42 }
 0x729   : > { %v1536_v26 = vpack.c.bf16 %v1535_v44, %v1535_v44 }
 0x72a   : > { %v1629_v45 = vpop.f32.mrb[40].mxu1 }
 0x72b   : > { %v1630_v46 = vadd.f32 %v2517_v11, %v1629_v45  ;;  %2271 = vmatmul.mubr.msk.bf16.vlgmr.msra.gmra.mrb[40].mxu0 %vm480_vm1, %v1536_v26  ;;  %v2280_v47 = vpop.f32.mrb[41].mxu1 }
 0x72c   : > { %2283 = vmatpush3.bf16.msra.mxu0 %v2503_v9  ;;  %v1632_v48 = vpop.f32.mrb[42].mxu1  ;;  %2286 = vmatprep.mubr.msk.bf16.mxu0 %vm2375_vm0, %v2374_v1 }
 0x72d   : > { %v1635_v49 = vmul.f32 0.1, %v1630_v46  ;;  %v2281_v50 = vpop.f32.mrb[43].mxu1  ;;  %2284 = vmatprep.subr.bf16.mxu0 %v2374_v1 }
 0x72f   : > { %v1636_v51 = vmax.f32 %v1630_v46, %v1635_v49 }
 0x730   : > { %2285 = vmatpush3.bf16.msra.mxu0 %v2510_v10 }
 0x731   : > { %v1637_v52 = vpack.c.bf16 %v1636_v51, %v1636_v51  ;;  %2298 = vmatprep.subr.bf16.mxu0 %v2374_v1 }
 0x733   : > { %2287 = vmatmul.mubr.msk.bf16.vlgmr.msra.gmra.mrb[44].mxu0 %vm480_vm1, %v1637_v52 }
 0x734   : > { %2302 = vmatprep.mubr.msk.bf16.mxu0 %vm2375_vm0, %v2374_v1  ;;  %2299 = vmatpush3.bf16.msra.mxu0 %v2346_v6 }
 0x735   : > { %2300 = vmatprep.subr.bf16.mxu0 %v2374_v1 }
 0x7fe   : > { %v1574_v9 = vpop.f32.mrb[40].mxu0 }
 0x7ff   : > { %v1575_v11 = vadd.f32 %v2608_v17, %v1574_v9  ;;  %v2272_v53 = vpop.f32.mrb[41].mxu0 }
 0x800   : > { %v1577_v54 = vpop.f32.mrb[42].mxu0 }
 0x801   : > { %v1580_v55 = vmul.f32 0.1, %v1575_v11  ;;  %v2273_v56 = vpop.f32.mrb[43].mxu0 }
 0x803   : > { %v1581_v57 = vmax.f32 %v1575_v11, %v1580_v55 }
 0x805   : > { %v1582_v58 = vadd.f32 %v1581_v57, %v1435_v38 }
 0x806   : > { %v1675_v59 = vpop.f32.mrb[44].mxu0 }
 0x807   : > { %v1676_v10 = vadd.f32 %v2553_v27, %v1675_v59  ;;  %v2288_v60 = vpop.f32.mrb[45].mxu0  ;;  %v2347_v27 = vld [vmem:[%s2778_s8 + $0x8] sm:$0xff]  }
 0x808   : > { %v1678_v61 = vpop.f32.mrb[46].mxu0  ;;  %2301 = vmatpush3.bf16.msra.mxu0 %v2347_v27 }
 0x809   : > { %v1681_v62 = vmul.f32 0.1, %v1676_v10  ;;  %v2289_v63 = vpop.f32.mrb[47].mxu0 }
 0x80b   : > { %v1682_v4 = vmax.f32 %v1676_v10, %v1681_v62 }
 0x80d   : > { %v1683_v5 = vpack.c.bf16 %v1682_v4, %v1682_v4 }
 0x80f   : > { %2295 = vmatmul.mubr.msk.bf16.vlgmr.msra.gmra.mrb[44].mxu1 %vm480_vm1, %v1683_v5 }
 0x810   : > { %2310 = vmatprep.mubr.msk.bf16.mxu1 %vm2375_vm0, %v2374_v1  ;;  %2307 = vmatpush3.bf16.msra.mxu1 %v2348_v24 }
 0x811   : > { %2308 = vmatprep.subr.bf16.mxu1 %v2374_v1  ;;  %v2022_v1 = vld [vmem:[%s2781_s11] ss:$0 sm:$0xff] }
 0x8e2   : > { %v1721_v7 = vpop.f32.mrb[44].mxu1 }
 0x8e3   : > { %v1722_v8 = vadd.f32 %v2608_v17, %v1721_v7  ;;  %v2296_v12 = vpop.f32.mrb[45].mxu1  ;;  %v2349_v17 = vld [vmem:[%s2780_s10 + $0x8] sm:$0xff]  }
 0x8e4   : > { %v1724_v13 = vpop.f32.mrb[46].mxu1  ;;  %2309 = vmatpush3.bf16.msra.mxu1 %v2349_v17 }
 0x8e5   : > { %v1727_v14 = vmul.f32 0.1, %v1722_v8  ;;  %v2297_v15 = vpop.f32.mrb[47].mxu1 }
 0x8e7   : > { %v1728_v16 = vmax.f32 %v1722_v8, %v1727_v14 }
 0x8e9   : > { %v1729_v19 = vadd.f32 %v1728_v16, %v1582_v58 }
 0x8eb   : > { %v1730_v20 = vadd.f32 %v1729_v19, %v498_v18 }
 0x8ed   : > { %1731 = vst.msk [vmem:[#allocation2] sm:$0xff] %vm480_vm1, %v1730_v20 }
 0x8f4   : > { %v1735_v21 = vld [vmem:[#allocation2] sm:$0xff] }
 0x8f5   : > { %v1736_v22 = vmul.f32 0.125, %v1735_v21 }
 0x8f7   : > { %v1737_v23 = vpack.c.bf16 %v1736_v22, %v1736_v22 }
 0x8f9   : > { %2303 = vmatmul.mubr.msk.bf16.vlgmr.msra.gmra.mrb[48].mxu0 %vm480_vm1, %v1737_v23 }
 0x9cc   : > { %v1798_v29 = vpop.f32.mrb[48].mxu0 }
 0x9cd   : > { %v1799_v30 = vadd.f32 %v2018_v28, %v1798_v29  ;;  %v2304_v31 = vpop.f32.mrb[49].mxu0 }
 0x9ce   : > { %v1801_v3 = vpop.f32.mrb[50].mxu0 }
 0x9cf   : > { %v1804_v32 = vmul.f32 0.1, %v1799_v30  ;;  %v2305_v0 = vpop.f32.mrb[51].mxu0 }
 0x9d1   : > { %v1805_v33 = vmax.f32 %v1799_v30, %v1804_v32 }
 0x9d3   : > { %v1806_v34 = vpack.c.bf16 %v1805_v33, %v1805_v33 }
 0x9d5   : > { %2311 = vmatmul.mubr.msk.bf16.vlgmr.msra.gmra.mrb[48].mxu1 %vm480_vm1, %v1806_v34 }
 0xaa8   : > { %v1867_v2 = vpop.f32.mrb[48].mxu1 }
 0xaa9   : > { %v1868_v35 = vadd.f32 %v2022_v1, %v1867_v2  ;;  %v2312_v36 = vpop.f32.mrb[49].mxu1 }
 0xaaa   : > { %v1870_v37 = vpop.f32.mrb[50].mxu1 }
 0xaab   : > { %v1873_v38 = vmul.f32 0.1, %v1868_v35  ;;  %v2313_v39 = vpop.f32.mrb[51].mxu1 }
 0xaad   : > { %v1874_v25 = vmax.f32 %v1868_v35, %v1873_v38 }
 0xaaf   : > { %1876 = vst.msk [vmem:[%s474_s17] sm:$0xff] %vm1875_vm2, %v1874_v25 }
 0xab0 PF: > { %s22_s23 = sadd.s32 1, %s2372_s23   ;;  %s2783_s21 = smov %s2368_s22 }
 0xab1   : > { %p19_p5 = scmp.ge.s32.totalorder %s22_s23, 4   ;;  %s2784_s22 = smov %s2786_s24 }
 0xab3   :  { %21 = sbr.rel (!%p19_p5) target bundleno = 2 (0x2), region = 109 }

</bundles_post_ra>
